<compile_context>
chip_gen: v7x
topology: tpu7x:2x2x1
jax: 0.10.0
libtpu: 0.0.40
codegen_flags: <defaults>
</compile_context>

<pallas_src>
import functools
import math

import jax
import jax.numpy as jnp
from jax import lax
from jax.experimental import pallas as pl
from jax.experimental.pallas import tpu as pltpu

LN_EPS = 1e-5  # nn.TransformerEncoderLayer default layer_norm_eps


def _round_up(x, m):
    return ((x + m - 1) // m) * m


def _device_tiling_defaults():
    """(max_rows, min_grid) heuristics per TPU generation."""
    max_rows, min_grid = 128, 1
    try:
        kind = jax.devices()[0].device_kind.lower()
    except Exception:
        return max_rows, min_grid
    if ("v6" in kind) or ("v7" in kind):
        max_rows = 256          # 256-wide MXU M stream on v6e/v7x
    if "v7" in kind:
        min_grid = 2            # 2 TensorCores per chip -> keep grid splittable
    return max_rows, min_grid


def _pick_batch_tile(B, S, max_rows, min_grid=1):
    """Largest divisor TB of B with TB*S a multiple of 8 and <= max_rows,
    preferring choices that leave at least `min_grid` grid steps."""
    legal = [tb for tb in range(1, B + 1)
             if B % tb == 0 and (tb * S) % 8 == 0 and tb * S <= max_rows]
    if not legal:
        # S is padded to a multiple of 8 by the wrapper; if even a single
        # batch element exceeds max_rows, just take one element per step.
        return 1
    pref = [tb for tb in legal if B // tb >= min_grid]
    return max(pref) if pref else max(legal)


def _encoder_kernel(sig_ref, pe_ref, mask_ref,
                    w_in_ref,
                    w_qkv_ref, b_qkv_ref,
                    w_o_ref, b_o_ref,
                    ln_ref,
                    w_ff1_ref, b_ff1_ref, w_ff2_ref, b_ff2_ref,
                    out_ref,
                    *, d_model, d_pad):
    bf16 = jnp.bfloat16
    f32 = jnp.float32

    # ---- input projection (sqrt(d_model) pre-folded into W) + PE (+ b_in) ----
    x = sig_ref[...].astype(bf16)                                   # (rows, I)
    h = jnp.dot(x, w_in_ref[...], preferred_element_type=f32)
    h = h + pe_ref[...]                                             # (rows, Hp) f32

    # ---- fused single-head QKV projection ----
    qkv = jnp.dot(h.astype(bf16), w_qkv_ref[...], preferred_element_type=f32)
    qkv = qkv + b_qkv_ref[...]                                      # (rows, 3*Hp)
    q = qkv[:, :d_pad].astype(bf16)           # 1/sqrt(d_model) folded into Wq/bq
    k = qkv[:, d_pad:2 * d_pad].astype(bf16)
    v = qkv[:, 2 * d_pad:].astype(bf16)

    # ---- attention for all rows at once; the precomputed additive mask keeps
    #      softmax block-diagonal per batch element and hides padded positions.
    s = lax.dot_general(q, k, (((1,), (1,)), ((), ())),
                        preferred_element_type=f32)                 # (rows, rows)
    s = s + mask_ref[...]

    m = jnp.max(s, axis=-1, keepdims=True)
    e = jnp.exp(s - m)
    p = e * pl.reciprocal(jnp.sum(e, axis=-1, keepdims=True), approx=True)

    attn = jnp.dot(p.astype(bf16), v, preferred_element_type=f32)   # (rows, Hp)
    attn = jnp.dot(attn.astype(bf16), w_o_ref[...], preferred_element_type=f32)
    attn = attn + b_o_ref[...]

    # ---- post-norm LayerNorms over the true d_model lanes (pad lanes are 0) ----
    lane = lax.broadcasted_iota(jnp.int32, (1, d_pad), 1)
    lane_mask = (lane < d_model).astype(f32)
    inv_d = jnp.float32(1.0 / d_model)

    def layer_norm(xv, gamma, beta):
        mu = jnp.sum(xv, axis=-1, keepdims=True) * inv_d   # pad lanes contribute 0
        d = (xv - mu) * lane_mask
        var = jnp.sum(d * d, axis=-1, keepdims=True) * inv_d
        return d * lax.rsqrt(var + LN_EPS) * gamma + beta

    x1 = layer_norm(h + attn, ln_ref[0:1, :], ln_ref[1:2, :])

    # ---- feed-forward: Linear(H->FF) -> ReLU -> Linear(FF->H) ----
    f = jnp.dot(x1.astype(bf16), w_ff1_ref[...], preferred_element_type=f32)
    f = jnp.maximum(f + b_ff1_ref[...], 0.0)
    f = jnp.dot(f.astype(bf16), w_ff2_ref[...], preferred_element_type=f32)
    f = f + b_ff2_ref[...]

    # bf16 lane-dense output store (halves writeback + wrapper slice traffic).
    out_ref[...] = layer_norm(x1 + f, ln_ref[2:3, :], ln_ref[3:4, :]).astype(out_ref.dtype)


def positional_encoding(seq_len, d_model):
    position = jnp.arange(seq_len, dtype=jnp.float32)[:, None]
    div_term = jnp.exp(jnp.arange(0, d_model, 2, dtype=jnp.float32)
                       * (-math.log(10000.0) / d_model))
    pe = jnp.zeros((seq_len, d_model), dtype=jnp.float32)
    pe = pe.at[:, 0::2].set(jnp.sin(position * div_term))
    pe = pe.at[:, 1::2].set(jnp.cos(position * div_term))
    return pe


def build_transformer_encoder(params, *, batch, seq, input_size,
                              max_rows=None, min_grid=None):
    """One-time prepare (pad / fuse / cast weights, build PE + mask, choose
    tiling); returns a jitted forward(signal) -> (B, S, H) f32."""
    B, S, I = batch, seq, input_size
    H = params["w_in"].shape[1]
    FF = params["w_ff1"].shape[1]
    Hp = _round_up(H, 128)
    FFp = _round_up(FF, 128)
    sqrt_d = math.sqrt(H)

    auto_rows, auto_grid = _device_tiling_defaults()
    if max_rows is None:
        max_rows = auto_rows
    if min_grid is None:
        min_grid = auto_grid

    S_pad = _round_up(S, 8)
    TB = _pick_batch_tile(B, S_pad, max_rows, min_grid)
    rows = TB * S_pad
    grid = (B // TB,)

    def pad2(a, r, c):
        return jnp.pad(a, ((0, r - a.shape[0]), (0, c - a.shape[1])))

    # Fold scales, zero-pad to lane-dense widths, cast matmul weights to bf16.
    w_in = pad2(params["w_in"] * sqrt_d, I, Hp).astype(jnp.bfloat16)
    w_qkv = jnp.concatenate([
        pad2(params["w_q"] / sqrt_d, Hp, Hp),
        pad2(params["w_k"], Hp, Hp),
        pad2(params["w_v"], Hp, Hp)], axis=1).astype(jnp.bfloat16)
    b_qkv = jnp.concatenate([
        pad2(params["b_q"] / sqrt_d, 1, Hp),
        pad2(params["b_k"], 1, Hp),
        pad2(params["b_v"], 1, Hp)], axis=1)
    w_o = pad2(params["w_o"], Hp, Hp).astype(jnp.bfloat16)
    b_o = pad2(params["b_o"], 1, Hp)
    ln = jnp.concatenate([
        pad2(params["ln1_g"], 1, Hp), pad2(params["ln1_b"], 1, Hp),
        pad2(params["ln2_g"], 1, Hp), pad2(params["ln2_b"], 1, Hp)], axis=0)
    # TODO(synk): on v7x the FFN weights could be stored as fp8 (e4m3) to halve
    # the dominant weight DMA; kept bf16 here for cross-generation accuracy.
    w_ff1 = pad2(params["w_ff1"], Hp, FFp).astype(jnp.bfloat16)
    b_ff1 = pad2(params["b_ff1"], 1, FFp)
    w_ff2 = pad2(params["w_ff2"], FFp, Hp).astype(jnp.bfloat16)
    b_ff2 = pad2(params["b_ff2"], 1, Hp)

    # Positional encoding rows for one tile, with b_in*sqrt(d_model) folded in.
    pe_rows = (jnp.tile(pad2(positional_encoding(S_pad, H), S_pad, Hp), (TB, 1))
               + pad2(params["b_in"] * sqrt_d, 1, Hp))              # (rows, Hp) f32

    # Precomputed additive attention mask: 0 where (same batch element within
    # the tile) AND (key is a real, non-padded position); -1e30 otherwise.
    # Rows inside a tile are (batch, seq)-ordered; keep this f32 (large negative
    # constant would overflow bf16).
    r_idx = jnp.arange(rows)
    same_batch = (r_idx[:, None] // S_pad) == (r_idx[None, :] // S_pad)
    key_valid = (r_idx[None, :] % S_pad) < S
    mask = jnp.where(same_batch & key_valid,
                     jnp.float32(0.0), jnp.float32(-1e30))          # (rows, rows)

    def const(shape):
        # NOTE: constant index maps -> fetched once; could add
        # pipeline_mode=pl.Buffered(1) to drop the second buffer, but the
        # total weight footprint (~2.6 MiB double-buffered) is far below the
        # scoped-VMEM default on every generation.
        return pl.BlockSpec(shape, lambda b: (0, 0))

    in_specs = [
        pl.BlockSpec((rows, I), lambda b: (b, 0)),     # signal rows (per-step tile)
        const((rows, Hp)),                             # positional encoding + b_in
        const((rows, rows)),                           # additive attention mask
        const((I, Hp)),                                # input proj (scale folded)
        const((Hp, 3 * Hp)), const((1, 3 * Hp)),       # fused Wq|Wk|Wv
        const((Hp, Hp)), const((1, Hp)),               # attention out proj
        const((4, Hp)),                                # LN1/LN2 gamma, beta
        const((Hp, FFp)), const((1, FFp)),             # FFN linear1
        const((FFp, Hp)), const((1, Hp)),              # FFN linear2
    ]

    kernel = functools.partial(_encoder_kernel, d_model=H, d_pad=Hp)
    pallas_fn = pl.pallas_call(
        kernel,
        out_shape=jax.ShapeDtypeStruct((B * S_pad, Hp), jnp.bfloat16),
        grid_spec=pltpu.PrefetchScalarGridSpec(
            num_scalar_prefetch=0,
            grid=grid,
            in_specs=in_specs,
            out_specs=pl.BlockSpec((rows, Hp), lambda b: (b, 0)),
        ),
        # NOTE(v7x): at these sizes the double-buffered bf16 FFN weights are
        # ~2 MiB, far under the 32 MiB scoped VMEM default.  If FF/rows are
        # scaled up, K-tile the FFN contraction and set vmem_limit_bytes.
        compiler_params=pltpu.CompilerParams(dimension_semantics=("parallel",)),
    )

    @jax.jit
    def forward(signal):
        sig = signal
        if S_pad != S:
            sig = jnp.pad(sig, ((0, 0), (0, S_pad - S), (0, 0)))
        sig2d = sig.reshape(B * S_pad, I)
        out = pallas_fn(sig2d, pe_rows, mask, w_in, w_qkv, b_qkv, w_o, b_o, ln,
                        w_ff1, b_ff1, w_ff2, b_ff2)
        out = out.reshape(B, S_pad, Hp)[:, :S, :H]
        return out.astype(jnp.float32)

    return forward


def reference_forward(signal, params):
    """Pure-JAX f32 reference (matches the PyTorch module semantics)."""
    H = params["w_in"].shape[1]
    pe = positional_encoding(signal.shape[1], H)
    h = signal @ params["w_in"] + params["b_in"]
    h = h * jnp.float32(math.sqrt(H)) + pe[None]
    q = h @ params["w_q"] + params["b_q"]
    k = h @ params["w_k"] + params["b_k"]
    v = h @ params["w_v"] + params["b_v"]
    s = jnp.einsum("bqd,bkd->bqk", q, k) / jnp.float32(math.sqrt(H))
    p = jax.nn.softmax(s, axis=-1)
    a = jnp.einsum("bqk,bkd->bqd", p, v) @ params["w_o"] + params["b_o"]
    x1 = h + a
    mu = x1.mean(-1, keepdims=True)
    var = ((x1 - mu) ** 2).mean(-1, keepdims=True)
    x1 = (x1 - mu) * lax.rsqrt(var + LN_EPS) * params["ln1_g"] + params["ln1_b"]
    f = jnp.maximum(x1 @ params["w_ff1"] + params["b_ff1"], 0.0) @ params["w_ff2"] + params["b_ff2"]
    x2 = x1 + f
    mu = x2.mean(-1, keepdims=True)
    var = ((x2 - mu) ** 2).mean(-1, keepdims=True)
    return (x2 - mu) * lax.rsqrt(var + LN_EPS) * params["ln2_g"] + params["ln2_b"]


def init_params(key, input_size, hidden_size, ff_size):
    ks = jax.random.split(key, 12)
    s = 0.05
    return {
        "w_in":  s * jax.random.normal(ks[0], (input_size, hidden_size), jnp.float32),
        "b_in":  s * jax.random.normal(ks[1], (1, hidden_size), jnp.float32),
        "w_q":   s * jax.random.normal(ks[2], (hidden_size, hidden_size), jnp.float32),
        "b_q":   jnp.zeros((1, hidden_size), jnp.float32),
        "w_k":   s * jax.random.normal(ks[3], (hidden_size, hidden_size), jnp.float32),
        "b_k":   jnp.zeros((1, hidden_size), jnp.float32),
        "w_v":   s * jax.random.normal(ks[4], (hidden_size, hidden_size), jnp.float32),
        "b_v":   jnp.zeros((1, hidden_size), jnp.float32),
        "w_o":   s * jax.random.normal(ks[5], (hidden_size, hidden_size), jnp.float32),
        "b_o":   s * jax.random.normal(ks[6], (1, hidden_size), jnp.float32),
        "ln1_g": jnp.ones((1, hidden_size), jnp.float32),
        "ln1_b": jnp.zeros((1, hidden_size), jnp.float32),
        "w_ff1": s * jax.random.normal(ks[7], (hidden_size, ff_size), jnp.float32),
        "b_ff1": s * jax.random.normal(ks[8], (1, ff_size), jnp.float32),
        "w_ff2": s * jax.random.normal(ks[9], (ff_size, hidden_size), jnp.float32),
        "b_ff2": s * jax.random.normal(ks[10], (1, hidden_size), jnp.float32),
        "ln2_g": jnp.ones((1, hidden_size), jnp.float32),
        "ln2_b": jnp.zeros((1, hidden_size), jnp.float32),
    }


if __name__ == "__main__":
    B, S, I, H = 2, 8, 16, 32
    FF = 2048  # nn.TransformerEncoderLayer default dim_feedforward

    key = jax.random.PRNGKey(0)
    k_sig, k_par = jax.random.split(key)
    signal = jax.random.normal(k_sig, (B, S, I), jnp.float32)
    params = init_params(k_par, I, H, FF)

    forward = build_transformer_encoder(params, batch=B, seq=S, input_size=I)
    out = jax.block_until_ready(forward(signal))

    ref = jax.block_until_ready(reference_forward(signal, params))
    assert out.shape == (B, S, H)
    assert bool(jnp.all(jnp.isfinite(out)))
    # bf16 MXU inputs / bf16 output store (f32 accumulation) vs all-f32 reference.
    assert bool(jnp.allclose(out, ref, atol=7.5e-2, rtol=7.5e-2))

    print("KERNEL_OK")
</pallas_src>

<mosaic_0001>
module attributes {stable_mosaic.version = 11 : i64} {
  func.func @_encoder_kernel(%arg0: i32, %arg1: memref<16x16xf32, #tpu.memory_space<vmem>>, %arg2: memref<16x128xf32, #tpu.memory_space<vmem>>, %arg3: memref<16x16xf32, #tpu.memory_space<vmem>>, %arg4: memref<16x128xbf16, #tpu.memory_space<vmem>>, %arg5: memref<128x384xbf16, #tpu.memory_space<vmem>>, %arg6: memref<1x384xf32, #tpu.memory_space<vmem>>, %arg7: memref<128x128xbf16, #tpu.memory_space<vmem>>, %arg8: memref<1x128xf32, #tpu.memory_space<vmem>>, %arg9: memref<4x128xf32, #tpu.memory_space<vmem>>, %arg10: memref<128x2048xbf16, #tpu.memory_space<vmem>>, %arg11: memref<1x2048xf32, #tpu.memory_space<vmem>>, %arg12: memref<2048x128xbf16, #tpu.memory_space<vmem>>, %arg13: memref<1x128xf32, #tpu.memory_space<vmem>>, %arg14: memref<16x128xbf16, #tpu.memory_space<vmem>>) attributes {dimension_semantics = [#tpu.dimension_semantics<parallel>], iteration_bounds = array<i64: 1>, scalar_prefetch = 0 : i64, scratch_operands = 0 : i64, tpu.core_type = #tpu.core_type<tc>, window_params = [{transform_indices = @transform_0, window_bounds = array<i64: 16, 16>}, {pipeline_mode = #tpu.pipeline_mode<synchronous>, transform_indices = @transform_1, window_bounds = array<i64: 16, 128>}, {pipeline_mode = #tpu.pipeline_mode<synchronous>, transform_indices = @transform_2, window_bounds = array<i64: 16, 16>}, {pipeline_mode = #tpu.pipeline_mode<synchronous>, transform_indices = @transform_3, window_bounds = array<i64: 16, 128>}, {pipeline_mode = #tpu.pipeline_mode<synchronous>, transform_indices = @transform_4, window_bounds = array<i64: 128, 384>}, {pipeline_mode = #tpu.pipeline_mode<synchronous>, transform_indices = @transform_5, window_bounds = array<i64: 1, 384>}, {pipeline_mode = #tpu.pipeline_mode<synchronous>, transform_indices = @transform_6, window_bounds = array<i64: 128, 128>}, {pipeline_mode = #tpu.pipeline_mode<synchronous>, transform_indices = @transform_7, window_bounds = array<i64: 1, 128>}, {pipeline_mode = #tpu.pipeline_mode<synchronous>, transform_indices = @transform_8, window_bounds = array<i64: 4, 128>}, {pipeline_mode = #tpu.pipeline_mode<synchronous>, transform_indices = @transform_9, window_bounds = array<i64: 128, 2048>}, {pipeline_mode = #tpu.pipeline_mode<synchronous>, transform_indices = @transform_10, window_bounds = array<i64: 1, 2048>}, {pipeline_mode = #tpu.pipeline_mode<synchronous>, transform_indices = @transform_11, window_bounds = array<i64: 2048, 128>}, {pipeline_mode = #tpu.pipeline_mode<synchronous>, transform_indices = @transform_12, window_bounds = array<i64: 1, 128>}, {transform_indices = @transform_13, window_bounds = array<i64: 16, 128>}]} {
    %c0 = arith.constant 0 : index
    %c0_0 = arith.constant 0 : index
    %0 = vector.load %arg1[%c0, %c0_0] : memref<16x16xf32, #tpu.memory_space<vmem>>, vector<16x16xf32>
    %1 = arith.truncf %0 : vector<16x16xf32> to vector<16x16xbf16>
    %c0_1 = arith.constant 0 : index
    %c0_2 = arith.constant 0 : index
    %2 = vector.load %arg4[%c0_1, %c0_2] : memref<16x128xbf16, #tpu.memory_space<vmem>>, vector<16x128xbf16>
    %cst = arith.constant dense<0.000000e+00> : vector<16x128xf32>
    %3 = tpu.matmul %1, %2, %cst {dimension_numbers = #tpu.dot_dimension_numbers<[1], [0], [0], [1], [0, 0, 1, 1], [], []>} : vector<16x16xbf16>, vector<16x128xbf16>, vector<16x128xf32> -> vector<16x128xf32>
    %c0_3 = arith.constant 0 : index
    %c0_4 = arith.constant 0 : index
    %4 = vector.load %arg2[%c0_3, %c0_4] : memref<16x128xf32, #tpu.memory_space<vmem>>, vector<16x128xf32>
    %5 = arith.addf %3, %4 : vector<16x128xf32>
    %6 = arith.truncf %5 : vector<16x128xf32> to vector<16x128xbf16>
    %c0_5 = arith.constant 0 : index
    %c0_6 = arith.constant 0 : index
    %7 = vector.load %arg5[%c0_5, %c0_6] : memref<128x384xbf16, #tpu.memory_space<vmem>>, vector<128x384xbf16>
    %cst_7 = arith.constant dense<0.000000e+00> : vector<16x384xf32>
    %8 = tpu.matmul %6, %7, %cst_7 {dimension_numbers = #tpu.dot_dimension_numbers<[1], [0], [0], [1], [0, 0, 1, 1], [], []>} : vector<16x128xbf16>, vector<128x384xbf16>, vector<16x384xf32> -> vector<16x384xf32>
    %c0_8 = arith.constant 0 : index
    %c0_9 = arith.constant 0 : index
    %9 = vector.load %arg6[%c0_8, %c0_9] : memref<1x384xf32, #tpu.memory_space<vmem>>, vector<1x384xf32>
    %10 = vector.broadcast %9 : vector<1x384xf32> to vector<16x384xf32>
    %11 = arith.addf %8, %10 : vector<16x384xf32>
    %12 = vector.extract_strided_slice %11 {offsets = [0, 0], sizes = [16, 128], strides = [1, 1]} : vector<16x384xf32> to vector<16x128xf32>
    %13 = arith.truncf %12 : vector<16x128xf32> to vector<16x128xbf16>
    %14 = vector.extract_strided_slice %11 {offsets = [0, 128], sizes = [16, 128], strides = [1, 1]} : vector<16x384xf32> to vector<16x128xf32>
    %15 = arith.truncf %14 : vector<16x128xf32> to vector<16x128xbf16>
    %16 = vector.extract_strided_slice %11 {offsets = [0, 256], sizes = [16, 128], strides = [1, 1]} : vector<16x384xf32> to vector<16x128xf32>
    %17 = arith.truncf %16 : vector<16x128xf32> to vector<16x128xbf16>
    %cst_10 = arith.constant dense<0.000000e+00> : vector<16x16xf32>
    %18 = tpu.matmul %13, %15, %cst_10 {dimension_numbers = #tpu.dot_dimension_numbers<[1], [1], [0], [0], [0, 0, 1, 0], [], []>} : vector<16x128xbf16>, vector<16x128xbf16>, vector<16x16xf32> -> vector<16x16xf32>
    %c0_11 = arith.constant 0 : index
    %c0_12 = arith.constant 0 : index
    %19 = vector.load %arg3[%c0_11, %c0_12] : memref<16x16xf32, #tpu.memory_space<vmem>>, vector<16x16xf32>
    %20 = arith.addf %18, %19 : vector<16x16xf32>
    %cst_13 = arith.constant dense<0xFF800000> : vector<16xf32>
    %21 = vector.multi_reduction <maximumf>, %20, %cst_13 [1] : vector<16x16xf32> to vector<16xf32>
    %22 = vector.shape_cast %21 : vector<16xf32> to vector<16x1xf32>
    %23 = vector.broadcast %22 : vector<16x1xf32> to vector<16x16xf32>
    %24 = arith.subf %20, %23 : vector<16x16xf32>
    %25 = math.exp %24 : vector<16x16xf32>
    %cst_14 = arith.constant dense<0.000000e+00> : vector<16xf32>
    %26 = vector.multi_reduction <add>, %25, %cst_14 [1] : vector<16x16xf32> to vector<16xf32>
    %27 = vector.shape_cast %26 : vector<16xf32> to vector<16x1xf32>
    %28 = tpu.reciprocal %27 {approx = true} : vector<16x1xf32> -> vector<16x1xf32>
    %29 = vector.broadcast %28 : vector<16x1xf32> to vector<16x16xf32>
    %30 = arith.mulf %25, %29 : vector<16x16xf32>
    %31 = arith.truncf %30 : vector<16x16xf32> to vector<16x16xbf16>
    %cst_15 = arith.constant dense<0.000000e+00> : vector<16x128xf32>
    %32 = tpu.matmul %31, %17, %cst_15 {dimension_numbers = #tpu.dot_dimension_numbers<[1], [0], [0], [1], [0, 0, 1, 1], [], []>} : vector<16x16xbf16>, vector<16x128xbf16>, vector<16x128xf32> -> vector<16x128xf32>
    %33 = arith.truncf %32 : vector<16x128xf32> to vector<16x128xbf16>
    %c0_16 = arith.constant 0 : index
    %c0_17 = arith.constant 0 : index
    %34 = vector.load %arg7[%c0_16, %c0_17] : memref<128x128xbf16, #tpu.memory_space<vmem>>, vector<128x128xbf16>
    %cst_18 = arith.constant dense<0.000000e+00> : vector<16x128xf32>
    %35 = tpu.matmul %33, %34, %cst_18 {dimension_numbers = #tpu.dot_dimension_numbers<[1], [0], [0], [1], [0, 0, 1, 1], [], []>} : vector<16x128xbf16>, vector<128x128xbf16>, vector<16x128xf32> -> vector<16x128xf32>
    %c0_19 = arith.constant 0 : index
    %c0_20 = arith.constant 0 : index
    %36 = vector.load %arg8[%c0_19, %c0_20] : memref<1x128xf32, #tpu.memory_space<vmem>>, vector<1x128xf32>
    %37 = vector.broadcast %36 : vector<1x128xf32> to vector<16x128xf32>
    %38 = arith.addf %35, %37 : vector<16x128xf32>
    %39 = tpu.iota {dimensions = array<i32: 1>} : vector<1x128xi32>
    %c32_i32 = arith.constant 32 : i32
    %40 = vector.broadcast %c32_i32 : i32 to vector<1x128xi32>
    %41 = arith.cmpi slt, %39, %40 : vector<1x128xi32>
    %42 = arith.extui %41 : vector<1x128xi1> to vector<1x128xi32>
    %43 = arith.sitofp %42 : vector<1x128xi32> to vector<1x128xf32>
    %44 = arith.addf %5, %38 : vector<16x128xf32>
    %c0_21 = arith.constant 0 : index
    %c0_22 = arith.constant 0 : index
    %45 = vector.load %arg9[%c0_21, %c0_22] : memref<4x128xf32, #tpu.memory_space<vmem>>, vector<1x128xf32>
    %c1 = arith.constant 1 : index
    %c0_23 = arith.constant 0 : index
    %46 = vector.load %arg9[%c1, %c0_23] : memref<4x128xf32, #tpu.memory_space<vmem>>, vector<1x128xf32>
    %cst_24 = arith.constant dense<0.000000e+00> : vector<16xf32>
    %47 = vector.multi_reduction <add>, %44, %cst_24 [1] : vector<16x128xf32> to vector<16xf32>
    %48 = vector.shape_cast %47 : vector<16xf32> to vector<16x1xf32>
    %cst_25 = arith.constant 3.125000e-02 : f32
    %49 = vector.broadcast %cst_25 : f32 to vector<16x1xf32>
    %50 = arith.mulf %48, %49 : vector<16x1xf32>
    %51 = vector.broadcast %50 : vector<16x1xf32> to vector<16x128xf32>
    %52 = arith.subf %44, %51 : vector<16x128xf32>
    %53 = vector.broadcast %43 : vector<1x128xf32> to vector<16x128xf32>
    %54 = arith.mulf %52, %53 : vector<16x128xf32>
    %55 = arith.mulf %54, %54 : vector<16x128xf32>
    %cst_26 = arith.constant dense<0.000000e+00> : vector<16xf32>
    %56 = vector.multi_reduction <add>, %55, %cst_26 [1] : vector<16x128xf32> to vector<16xf32>
    %57 = vector.shape_cast %56 : vector<16xf32> to vector<16x1xf32>
    %cst_27 = arith.constant 3.125000e-02 : f32
    %58 = vector.broadcast %cst_27 : f32 to vector<16x1xf32>
    %59 = arith.mulf %57, %58 : vector<16x1xf32>
    %cst_28 = arith.constant 9.99999974E-6 : f32
    %60 = vector.broadcast %cst_28 : f32 to vector<16x1xf32>
    %61 = arith.addf %59, %60 : vector<16x1xf32>
    %62 = math.rsqrt %61 : vector<16x1xf32>
    %63 = vector.broadcast %62 : vector<16x1xf32> to vector<16x128xf32>
    %64 = arith.mulf %54, %63 : vector<16x128xf32>
    %65 = vector.broadcast %45 : vector<1x128xf32> to vector<16x128xf32>
    %66 = arith.mulf %64, %65 : vector<16x128xf32>
    %67 = vector.broadcast %46 : vector<1x128xf32> to vector<16x128xf32>
    %68 = arith.addf %66, %67 : vector<16x128xf32>
    %69 = arith.truncf %68 : vector<16x128xf32> to vector<16x128xbf16>
    %c0_29 = arith.constant 0 : index
    %c0_30 = arith.constant 0 : index
    %70 = vector.load %arg10[%c0_29, %c0_30] : memref<128x2048xbf16, #tpu.memory_space<vmem>>, vector<128x2048xbf16>
    %cst_31 = arith.constant dense<0.000000e+00> : vector<16x2048xf32>
    %71 = tpu.matmul %69, %70, %cst_31 {dimension_numbers = #tpu.dot_dimension_numbers<[1], [0], [0], [1], [0, 0, 1, 1], [], []>} : vector<16x128xbf16>, vector<128x2048xbf16>, vector<16x2048xf32> -> vector<16x2048xf32>
    %c0_32 = arith.constant 0 : index
    %c0_33 = arith.constant 0 : index
    %72 = vector.load %arg11[%c0_32, %c0_33] : memref<1x2048xf32, #tpu.memory_space<vmem>>, vector<1x2048xf32>
    %73 = vector.broadcast %72 : vector<1x2048xf32> to vector<16x2048xf32>
    %74 = arith.addf %71, %73 : vector<16x2048xf32>
    %cst_34 = arith.constant 0.000000e+00 : f32
    %75 = vector.broadcast %cst_34 : f32 to vector<16x2048xf32>
    %76 = arith.maximumf %74, %75 : vector<16x2048xf32>
    %77 = arith.truncf %76 : vector<16x2048xf32> to vector<16x2048xbf16>
    %c0_35 = arith.constant 0 : index
    %c0_36 = arith.constant 0 : index
    %78 = vector.load %arg12[%c0_35, %c0_36] : memref<2048x128xbf16, #tpu.memory_space<vmem>>, vector<2048x128xbf16>
    %cst_37 = arith.constant dense<0.000000e+00> : vector<16x128xf32>
    %79 = tpu.matmul %77, %78, %cst_37 {dimension_numbers = #tpu.dot_dimension_numbers<[1], [0], [0], [1], [0, 0, 1, 1], [], []>} : vector<16x2048xbf16>, vector<2048x128xbf16>, vector<16x128xf32> -> vector<16x128xf32>
    %c0_38 = arith.constant 0 : index
    %c0_39 = arith.constant 0 : index
    %80 = vector.load %arg13[%c0_38, %c0_39] : memref<1x128xf32, #tpu.memory_space<vmem>>, vector<1x128xf32>
    %81 = vector.broadcast %80 : vector<1x128xf32> to vector<16x128xf32>
    %82 = arith.addf %79, %81 : vector<16x128xf32>
    %83 = arith.addf %68, %82 : vector<16x128xf32>
    %c2 = arith.constant 2 : index
    %c0_40 = arith.constant 0 : index
    %84 = vector.load %arg9[%c2, %c0_40] : memref<4x128xf32, #tpu.memory_space<vmem>>, vector<1x128xf32>
    %c3 = arith.constant 3 : index
    %c0_41 = arith.constant 0 : index
    %85 = vector.load %arg9[%c3, %c0_41] : memref<4x128xf32, #tpu.memory_space<vmem>>, vector<1x128xf32>
    %cst_42 = arith.constant dense<0.000000e+00> : vector<16xf32>
    %86 = vector.multi_reduction <add>, %83, %cst_42 [1] : vector<16x128xf32> to vector<16xf32>
    %87 = vector.shape_cast %86 : vector<16xf32> to vector<16x1xf32>
    %cst_43 = arith.constant 3.125000e-02 : f32
    %88 = vector.broadcast %cst_43 : f32 to vector<16x1xf32>
    %89 = arith.mulf %87, %88 : vector<16x1xf32>
    %90 = vector.broadcast %89 : vector<16x1xf32> to vector<16x128xf32>
    %91 = arith.subf %83, %90 : vector<16x128xf32>
    %92 = vector.broadcast %43 : vector<1x128xf32> to vector<16x128xf32>
    %93 = arith.mulf %91, %92 : vector<16x128xf32>
    %94 = arith.mulf %93, %93 : vector<16x128xf32>
    %cst_44 = arith.constant dense<0.000000e+00> : vector<16xf32>
    %95 = vector.multi_reduction <add>, %94, %cst_44 [1] : vector<16x128xf32> to vector<16xf32>
    %96 = vector.shape_cast %95 : vector<16xf32> to vector<16x1xf32>
    %cst_45 = arith.constant 3.125000e-02 : f32
    %97 = vector.broadcast %cst_45 : f32 to vector<16x1xf32>
    %98 = arith.mulf %96, %97 : vector<16x1xf32>
    %cst_46 = arith.constant 9.99999974E-6 : f32
    %99 = vector.broadcast %cst_46 : f32 to vector<16x1xf32>
    %100 = arith.addf %98, %99 : vector<16x1xf32>
    %101 = math.rsqrt %100 : vector<16x1xf32>
    %102 = vector.broadcast %101 : vector<16x1xf32> to vector<16x128xf32>
    %103 = arith.mulf %93, %102 : vector<16x128xf32>
    %104 = vector.broadcast %84 : vector<1x128xf32> to vector<16x128xf32>
    %105 = arith.mulf %103, %104 : vector<16x128xf32>
    %106 = vector.broadcast %85 : vector<1x128xf32> to vector<16x128xf32>
    %107 = arith.addf %105, %106 : vector<16x128xf32>
    %108 = arith.truncf %107 : vector<16x128xf32> to vector<16x128xbf16>
    %c0_47 = arith.constant 0 : index
    %c0_48 = arith.constant 0 : index
    %109 = vector.load %arg14[%c0_47, %c0_48] : memref<16x128xbf16, #tpu.memory_space<vmem>>, vector<16x128xbf16>
    tpu.vector_store %arg14[%c0_47, %c0_48], %108 {strides = array<i32>} : memref<16x128xbf16, #tpu.memory_space<vmem>>, vector<16x128xbf16>,
    return
  }
  func.func @transform_0(%arg0: i32) -> (i32, i32) {
    %c0_i32 = arith.constant 0 : i32
    %c0_i32_0 = arith.constant 0 : i32
    return %arg0, %c0_i32 : i32, i32
  }
  func.func @transform_1(%arg0: i32) -> (i32, i32) {
    %c0_i32 = arith.constant 0 : i32
    %c0_i32_0 = arith.constant 0 : i32
    %c0_i32_1 = arith.constant 0 : i32
    return %c0_i32, %c0_i32_0 : i32, i32
  }
  func.func @transform_2(%arg0: i32) -> (i32, i32) {
    %c0_i32 = arith.constant 0 : i32
    %c0_i32_0 = arith.constant 0 : i32
    %c0_i32_1 = arith.constant 0 : i32
    return %c0_i32, %c0_i32_0 : i32, i32
  }
  func.func @transform_3(%arg0: i32) -> (i32, i32) {
    %c0_i32 = arith.constant 0 : i32
    %c0_i32_0 = arith.constant 0 : i32
    %c0_i32_1 = arith.constant 0 : i32
    return %c0_i32, %c0_i32_0 : i32, i32
  }
  func.func @transform_4(%arg0: i32) -> (i32, i32) {
    %c0_i32 = arith.constant 0 : i32
    %c0_i32_0 = arith.constant 0 : i32
    %c0_i32_1 = arith.constant 0 : i32
    return %c0_i32, %c0_i32_0 : i32, i32
  }
  func.func @transform_5(%arg0: i32) -> (i32, i32) {
    %c0_i32 = arith.constant 0 : i32
    %c0_i32_0 = arith.constant 0 : i32
    %c0_i32_1 = arith.constant 0 : i32
    return %c0_i32, %c0_i32_0 : i32, i32
  }
  func.func @transform_6(%arg0: i32) -> (i32, i32) {
    %c0_i32 = arith.constant 0 : i32
    %c0_i32_0 = arith.constant 0 : i32
    %c0_i32_1 = arith.constant 0 : i32
    return %c0_i32, %c0_i32_0 : i32, i32
  }
  func.func @transform_7(%arg0: i32) -> (i32, i32) {
    %c0_i32 = arith.constant 0 : i32
    %c0_i32_0 = arith.constant 0 : i32
    %c0_i32_1 = arith.constant 0 : i32
    return %c0_i32, %c0_i32_0 : i32, i32
  }
  func.func @transform_8(%arg0: i32) -> (i32, i32) {
    %c0_i32 = arith.constant 0 : i32
    %c0_i32_0 = arith.constant 0 : i32
    %c0_i32_1 = arith.constant 0 : i32
    return %c0_i32, %c0_i32_0 : i32, i32
  }
  func.func @transform_9(%arg0: i32) -> (i32, i32) {
    %c0_i32 = arith.constant 0 : i32
    %c0_i32_0 = arith.constant 0 : i32
    %c0_i32_1 = arith.constant 0 : i32
    return %c0_i32, %c0_i32_0 : i32, i32
  }
  func.func @transform_10(%arg0: i32) -> (i32, i32) {
    %c0_i32 = arith.constant 0 : i32
    %c0_i32_0 = arith.constant 0 : i32
    %c0_i32_1 = arith.constant 0 : i32
    return %c0_i32, %c0_i32_0 : i32, i32
  }
  func.func @transform_11(%arg0: i32) -> (i32, i32) {
    %c0_i32 = arith.constant 0 : i32
    %c0_i32_0 = arith.constant 0 : i32
    %c0_i32_1 = arith.constant 0 : i32
    return %c0_i32, %c0_i32_0 : i32, i32
  }
  func.func @transform_12(%arg0: i32) -> (i32, i32) {
    %c0_i32 = arith.constant 0 : i32
    %c0_i32_0 = arith.constant 0 : i32
    %c0_i32_1 = arith.constant 0 : i32
    return %c0_i32, %c0_i32_0 : i32, i32
  }
  func.func @transform_13(%arg0: i32) -> (i32, i32) {
    %c0_i32 = arith.constant 0 : i32
    %c0_i32_0 = arith.constant 0 : i32
    return %arg0, %c0_i32 : i32, i32
  }
}

</mosaic_0001>

<bundles_post_ra>
// kernel: forward.1
= control target key start
LH: loop header
LB: loop body
LE: loop exit
PB: predicated region body
PF: predicated region fallthrough
CT: control target
= control target key end

     0   :  { %v4047_v0 = vmov 0.0   ;;  %vm4048_vm0 = vmmov 0   ;;  %vm58_vm1 = vcmask 130048   ;;  %v4049_v29 = vmov 0   ;;  %s5205_s3 = inlined_call_operand.vmem [shape: bf16[16,128], index: 3, kind: input, shape index: {}]   ;;  %s5206_s0 = inlined_call_operand.vmem [shape: f32[16,16], index: 0, kind: input, shape index: {}]   ;;  %s5207_s4 = inlined_call_operand.vmem [shape: bf16[128,384], index: 4, kind: input, shape index: {}]   ;;  %s5208_s1 = inlined_call_operand.vmem [shape: f32[16,128], index: 1, kind: input, shape index: {}]   ;;  %s5209_s5 = inlined_call_operand.vmem [shape: f32[1,384], index: 5, kind: input, shape index: {}]   ;;  %s5210_s2 = inlined_call_operand.vmem [shape: f32[16,16], index: 2, kind: input, shape index: {}]   ;;  %s5211_s6 = inlined_call_operand.vmem [shape: bf16[128,128], index: 6, kind: input, shape index: {}]   ;;  %s5212_s7 = inlined_call_operand.vmem [shape: f32[1,128], index: 7, kind: input, shape index: {}]   ;;  %s5213_s9 = inlined_call_operand.vmem [shape: bf16[128,2048], index: 9, kind: input, shape index: {}]   ;;  %s5214_s11 = inlined_call_operand.vmem [shape: bf16[2048,128], index: 11, kind: input, shape index: {}]   ;;  %s5215_s8 = inlined_call_operand.vmem [shape: f32[4,128], index: 8, kind: input, shape index: {}]   ;;  %s5216_s10 = inlined_call_operand.vmem [shape: f32[1,2048], index: 10, kind: input, shape index: {}]   ;;  %s5217_s12 = inlined_call_operand.vmem [shape: f32[1,128], index: 12, kind: input, shape index: {}]   ;;  %s5218_s13 = inlined_call_operand.vmem [shape: bf16[16,128], index: 13, kind: output, shape index: {}]  }
   0x1   :  { %3801 = vmatprep.subr.bf16.mxu0 %v4047_v0  ;;  %v3862_v1 = vld [vmem:[%s5205_s3] sm:$0xff]   ;;  %3803 = vmatprep.mubr.msk.bf16.mxu0 %vm4048_vm0, %v4047_v0  ;;  %v46_v3 = vld [vmem:[%s5206_s0 + $0x8] sm:$0xff]  ;;  %v3873_v12 = vld [vmem:[%s5207_s4 + $0x30] ss:$12 sps:$4 sm:$0xff]   ;;  %v138_v39 = vlaneseq }
   0x2   :  { %v45_v2 = vld [vmem:[%s5206_s0] sm:$0xff]  ;;  %3802 = vmatpush3.bf16.msra.mxu0 %v3862_v1  ;;  %v3866_v7 = vld [vmem:[%s5207_s4 + $0x8] ss:$12 sps:$4 sm:$0xff]   ;;  %v3875_v14 = vld [vmem:[%s5207_s4 + $0x4c] ss:$12 sps:$4 sm:$0xff]   ;;  %313 = vmatprep.mubr.bf16.mxu1 %v4049_v29 }
   0x3   :  { %v47_v4 = vpack.c.bf16 %v46_v3, %v45_v2  ;;  %v3863_v5 = vld [vmem:[%s5207_s4 + $0x4] ss:$12 sps:$4 sm:$0xff]   ;;  %v3865_v6 = vld [vmem:[%s5207_s4] ss:$12 sps:$4 sm:$0xff]   ;;  %3807 = vmatprep.subr.bf16.mxu0 %v4047_v0  ;;  %v3867_v8 = vld [vmem:[%s5207_s4 + $0x1c] ss:$12 sps:$4 sm:$0xff]  }
   0x4   :  { %281 = vmatprep.subr.bf16.mxu1 %v3863_v5  ;;  %v3869_v9 = vld [vmem:[%s5207_s4 + $0x18] ss:$12 sps:$4 sm:$0xff]   ;;  %v3870_v10 = vld [vmem:[%s5207_s4 + $0x20] ss:$12 sps:$4 sm:$0xff]   ;;  %v3877_v15 = vld [vmem:[%s5207_s4 + $0x48] ss:$12 sps:$4 sm:$0xff]  }
   0x5   :  { %3804 = vmatmul.mubr.msk.bf16.vlgmr.msra.gmra.mrb[0].mxu0 %vm58_vm1, %v47_v4  ;;  %282 = vmatpush1.bf16.msra.mxu1 %v3865_v6  ;;  %v3871_v11 = vld [vmem:[%s5207_s4 + $0x34] ss:$12 sps:$4 sm:$0xff]   ;;  %v3874_v13 = vld [vmem:[%s5207_s4 + $0x38] ss:$12 sps:$4 sm:$0xff]   ;;  %v3878_v16 = vld [vmem:[%s5207_s4 + $0x50] ss:$12 sps:$4 sm:$0xff]  }
   0x6   :  { %3808 = vmatpush3.bf16.msra.mxu0 %v3866_v7  ;;  %283 = vmatprep.subr.bf16.mxu1 %v3867_v8  ;;  %v3879_v17 = vld [vmem:[%s5207_s4 + $0x64] ss:$12 sps:$4 sm:$0xff]   ;;  %v3881_v18 = vld [vmem:[%s5207_s4 + $0x60] ss:$12 sps:$4 sm:$0xff]   ;;  %v3882_v19 = vld [vmem:[%s5207_s4 + $0x68] ss:$12 sps:$4 sm:$0xff]  }
   0x7   :  { %3809 = vmatprep.subr.bf16.mxu0 %v4047_v0  ;;  %3823 = vmatprep.mubr.msk.bf16.mxu0 %vm4048_vm0, %v4047_v0  ;;  %v3883_v20 = vld [vmem:[%s5207_s4 + $0x7c] ss:$12 sps:$4 sm:$0xff]   ;;  %v3885_v21 = vld [vmem:[%s5207_s4 + $0x78] ss:$12 sps:$4 sm:$0xff]   ;;  %v3886_v22 = vld [vmem:[%s5207_s4 + $0x80] ss:$12 sps:$4 sm:$0xff]  }
   0x8   :  { %v3887_v23 = vld [vmem:[%s5207_s4 + $0x94] ss:$12 sps:$4 sm:$0xff]   ;;  %v3889_v24 = vld [vmem:[%s5207_s4 + $0x90] ss:$12 sps:$4 sm:$0xff]   ;;  %v3890_v25 = vld [vmem:[%s5207_s4 + $0x98] ss:$12 sps:$4 sm:$0xff]  }
   0x9   :  { %284 = vmatpush1.bf16.msra.mxu1 %v3869_v9  ;;  %v3891_v26 = vld [vmem:[%s5207_s4 + $0xac] ss:$12 sps:$4 sm:$0xff]   ;;  %v3893_v27 = vld [vmem:[%s5207_s4 + $0xa8] ss:$12 sps:$4 sm:$0xff]   ;;  %v3894_v28 = vld [vmem:[%s5207_s4 + $0xb0] ss:$12 sps:$4 sm:$0xff]  }
   0xa   :  { %3810 = vmatpush3.bf16.msra.mxu0 %v3870_v10  ;;  %285 = vmatprep.subr.bf16.mxu1 %v3871_v11  ;;  %v50_v30 = vld [vmem:[%s5208_s1] sm:$0xff]  ;;  %v51_v32 = vld [vmem:[%s5208_s1 + $0x8] sm:$0xff]  ;;  %v4235_v40 = vshrl.u32 %v138_v39, 7 }
   0xb   :  { %3811 = vmatprep.subr.bf16.mxu0 %v4047_v0  ;;  %v136_v43 = vld [vmem:[%s5209_s5] sm:$0x7]  ;;  %v369_v4 = vld [vmem:[%s5210_s2 + $0x8] sm:$0xff] }
   0xc   :  { %v4238_v41 = vsub.s32 0, %v4235_v40  ;;  %v4241_v42 = vsub.s32 2, %v4235_v40  ;;  %v4247_v44 = vsub.s32 1, %v4235_v40  ;;  %v368_v2 = vld [vmem:[%s5210_s2] sm:$0xff] }
   0xd   :  { %286 = vmatpush1.bf16.msra.mxu1 %v3873_v12 }
   0xe   :  { %3812 = vmatpush3.bf16.msra.mxu0 %v3874_v13  ;;  %287 = vmatprep.subr.bf16.mxu1 %v3875_v14  ;;  %v141_v45 = vrot.slane %v136_v43, %v4238_v41  ;;  %v149_v46 = vrot.slane %v136_v43, %v4241_v42  ;;  %v145_v49 = vrot.slane %v136_v43, %v4247_v44  ;;  %v3902_v43 = vld [vmem:[%s5211_s6 + $0x38] sm:$0xff]  }
   0xf   :  { %3813 = vmatprep.subr.bf16.mxu0 %v4047_v0 }
  0x11   :  { %288 = vmatpush1.bf16.msra.mxu1 %v3877_v15 }
  0x12   :  { %3814 = vmatpush3.bf16.msra.mxu0 %v3878_v16  ;;  %289 = vmatprep.subr.bf16.mxu1 %v3879_v17 }
  0x13   :  { %3815 = vmatprep.subr.bf16.mxu0 %v4047_v0 }
  0x15   :  { %290 = vmatpush1.bf16.msra.mxu1 %v3881_v18 }
  0x16   :  { %3816 = vmatpush3.bf16.msra.mxu0 %v3882_v19  ;;  %291 = vmatprep.subr.bf16.mxu1 %v3883_v20 }
  0x17   :  { %3817 = vmatprep.subr.bf16.mxu0 %v4047_v0 }
  0x19   :  { %292 = vmatpush1.bf16.msra.mxu1 %v3885_v21 }
  0x1a   :  { %3818 = vmatpush3.bf16.msra.mxu0 %v3886_v22  ;;  %293 = vmatprep.subr.bf16.mxu1 %v3887_v23  ;;  %v3895_v22 = vld [vmem:[%s5211_s6] sm:$0xff]   ;;  %v3896_v23 = vld [vmem:[%s5211_s6 + $0x8] sm:$0xff]  }
  0x1b   :  { %3819 = vmatprep.subr.bf16.mxu0 %v4047_v0 }
  0x1d   :  { %294 = vmatpush1.bf16.msra.mxu1 %v3889_v24  ;;  %v3897_v24 = vld [vmem:[%s5211_s6 + $0x10] sm:$0xff]  }
  0x1e   :  { %3820 = vmatpush3.bf16.msra.mxu0 %v3890_v25  ;;  %295 = vmatprep.subr.bf16.mxu1 %v3891_v26  ;;  %v3898_v25 = vld [vmem:[%s5211_s6 + $0x18] sm:$0xff]   ;;  %v3899_v26 = vld [vmem:[%s5211_s6 + $0x20] sm:$0xff]  }
  0x1f   :  { %3821 = vmatprep.subr.bf16.mxu0 %v4047_v0 }
  0x21   :  { %296 = vmatpush1.bf16.msra.mxu1 %v3893_v27  ;;  %v3900_v27 = vld [vmem:[%s5211_s6 + $0x28] sm:$0xff]  }
  0x22   :  { %3822 = vmatpush3.bf16.msra.mxu0 %v3894_v28  ;;  %3839 = vmatprep.subr.bf16.mxu1 %v4047_v0  ;;  %v3901_v28 = vld [vmem:[%s5211_s6 + $0x30] sm:$0xff]  }
  0x23   :  { %3827 = vmatprep.subr.bf16.mxu0 %v4047_v0 }
  0xd8   :  { %v96_v31 = vpop.f32.mrb[0].mxu0 }
  0xd9   :  { %v3805_v33 = vpop.f32.mrb[1].mxu0  ;;  %v4224_v35 = vadd.f32 %v96_v31, %v50_v30 }
  0xda   :  { %v99_v34 = vpop.f32.mrb[2].mxu0 }
  0xdb   :  { %v4226_v36 = vadd.f32 %v99_v34, %v51_v32  ;;  %v3806_v37 = vpop.f32.mrb[3].mxu0 }
  0xdd   :  { %v103_v38 = vpack.c.bf16 %v4226_v36, %v4224_v35 }
  0xdf   :  { %314 = vmatmul.mubr.bf16.vlgmr.msra.gmra.mrb[0].mxu1 %v103_v38  ;;  %3824 = vmatmul.mubr.bf16.vlgmr.msra.gmra.mrb[4].mxu0 %v103_v38 }
  0xe0   :  { %3829 = vmatprep.mubr.msk.bf16.mxu0 %vm4048_vm0, %v4047_v0  ;;  %3855 = vmatprep.mubr.msk.bf16.mxu1 %vm4048_vm0, %v4047_v0 }
  0xe1   :  { %3840 = vmatpush3.bf16.msra.mxu1 %v3895_v22  ;;  %v670_v22 = vld [vmem:[%s5213_s9 + $0x108] sm:$0xff] }
  0xe2   :  { %3841 = vmatprep.subr.bf16.mxu1 %v4047_v0 }
  0xe5   :  { %3842 = vmatpush3.bf16.msra.mxu1 %v3896_v23 }
  0xe6   :  { %3843 = vmatprep.subr.bf16.mxu1 %v4047_v0 }
  0xe9   :  { %3844 = vmatpush3.bf16.msra.mxu1 %v3897_v24  ;;  %v678_v24 = vld [vmem:[%s5213_s9 + $0x148] sm:$0xff] }
  0xea   :  { %3845 = vmatprep.subr.bf16.mxu1 %v4047_v0 }
  0xed   :  { %3846 = vmatpush3.bf16.msra.mxu1 %v3898_v25 }
  0xee   :  { %3847 = vmatprep.subr.bf16.mxu1 %v4047_v0 }
  0xf1   :  { %3848 = vmatpush3.bf16.msra.mxu1 %v3899_v26  ;;  %v3367_v26 = vcombine.low %v670_v22, %v678_v24 }
  0xf2   :  { %3849 = vmatprep.subr.bf16.mxu1 %v4047_v0 }
  0xf5   :  { %3850 = vmatpush3.bf16.msra.mxu1 %v3900_v27  ;;  %v3368_v27 = vcombine.high %v670_v22, %v678_v24 }
  0xf6   :  { %3851 = vmatprep.subr.bf16.mxu1 %v4047_v0 }
  0xf9   :  { %3852 = vmatpush3.bf16.msra.mxu1 %v3901_v28  ;;  %v685_v28 = vld [vmem:[%s5213_s9 + $0x180] sm:$0xff] }
  0xfa   :  { %3853 = vmatprep.subr.bf16.mxu1 %v4047_v0 }
  0xfd   :  { %3854 = vmatpush3.bf16.msra.mxu1 %v3902_v43  ;;  %v701_v43 = vld [vmem:[%s5213_s9 + $0x200] sm:$0xff] }
 0x1b2   :  { %v315_v47 = vpop.f32.mrb[0].mxu1  ;;  %v358_v48 = vpop.f32.mrb[4].mxu0 }
 0x1b3   :  { %v317_v50 = vpop.f32.mrb[1].mxu1  ;;  %v3825_v51 = vpop.f32.mrb[5].mxu0  ;;  %v316_v54 = vadd.f32 %v315_v47, %v141_v45  ;;  %v359_v55 = vadd.f32 %v358_v48, %v149_v46 }
 0x1b4   :  { %v319_v52 = vpop.f32.mrb[2].mxu1  ;;  %v361_v53 = vpop.f32.mrb[6].mxu0  ;;  %v318_v60 = vadd.f32 %v317_v50, %v145_v49  ;;  %v3321_v50 = vld [vmem:[%s5212_s7] ss:$0 sm:$0xff] }
 0x1b5   :  { %v320_v56 = vadd.f32 %v319_v52, %v141_v45  ;;  %v362_v57 = vadd.f32 %v361_v53, %v149_v46  ;;  %v321_v58 = vpop.f32.mrb[3].mxu1  ;;  %v3826_v59 = vpop.f32.mrb[7].mxu0 }
 0x1b6   :  { %v322_v61 = vadd.f32 %v321_v58, %v145_v49  ;;  %v637_v59 = vld [vmem:[%s5213_s9] sm:$0xff] }
 0x1b7   :  { %v365_v62 = vpack.c.bf16 %v320_v56, %v316_v54  ;;  %v367_v63 = vpack.c.bf16 %v362_v57, %v359_v55 }
 0x1b8   :  { %v366_v1 = vpack.c.bf16 %v322_v61, %v318_v60  ;;  %v645_v60 = vld [vmem:[%s5213_s9 + $0x40] sm:$0xff]  ;;  %v638_v61 = vld [vmem:[%s5213_s9 + $0x8] sm:$0xff] }
 0x1ba   :  { %3828 = vmatpush3.bf16.xpose.msra.mxu0 %v366_v1  ;;  %v661_v1 = vld [vmem:[%s5213_s9 + $0xc0] sm:$0xff] }
 0x1bb   :  { %3833 = vmatprep.subr.bf16.mxu0 %v4047_v0 }
 0x1c1   :  { %3830 = vmatmul.mubr.bf16.vlgmr.msra.gmra.mrb[8].mxu0 %v365_v62  ;;  %v3333_v62 = vcombine.low %v637_v59, %v645_v60 }
 0x1c2   :  { %3834 = vmatpush3.bf16.msra.mxu0 %v367_v63  ;;  %3835 = vmatprep.mubr.msk.bf16.mxu0 %vm4048_vm0, %v4047_v0  ;;  %v3334_v63 = vcombine.high %v637_v59, %v645_v60  ;;  %v733_v60 = vld [vmem:[%s5213_s9 + $0x300] sm:$0xff] }
 0x1c4   :  { %1489 = vmatprep.subr.bf16.mxu0 %v3334_v63 }
 0x294   :  { %v404_v3 = vpop.f32.mrb[8].mxu0 }
 0x295   :  { %v405_v5 = vadd.f32 %v404_v3, %v368_v2  ;;  %v3831_v6 = vpop.f32.mrb[9].mxu0 }
 0x296   :  { %v407_v7 = vpop.f32.mrb[10].mxu0  ;;  %v662_v6 = vld [vmem:[%s5213_s9 + $0xc8] sm:$0xff] }
 0x297   :  { %v408_v8 = vadd.f32 %v407_v7, %v369_v4  ;;  %v3832_v9 = vpop.f32.mrb[11].mxu0  ;;  %v411_v10 = vsel %vm58_vm1, %v405_v5, -inf }
 0x298   :  { %412 = vmax.xlane.f32.xlu0 %v411_v10  ;;  %v592_v10 = vand.u32 127, %v138_v39 }
 0x299   :  { %v414_v11 = vsel %vm58_vm1, %v408_v8, -inf }
 0x29a   :  { %vm593_vm2 = vcmp.lt.s32.totalorder %v592_v10, 32 }
 0x29c   :  { %415 = vmax.xlane.f32.xlu0 %v414_v11 }
 0x325   :  { %v413_v12 = vpop.xlane.xlu0 %412 }
 0x326   :  { %v417_v13 = vsub.f32 %v405_v5, %v413_v12  ;;  %v654_v5 = vld [vmem:[%s5213_s9 + $0x88] sm:$0xff] }
 0x327   :  { %v3352_v7 = vcombine.high %v654_v5, %v662_v6  ;;  %v3351_v9 = vcombine.low %v654_v5, %v662_v6  ;;  %v750_v5 = vld [vmem:[%s5213_s9 + $0x388] sm:$0xff] }
 0x328   :  { %v419_v14 = vmul.f32 1.442695, %v417_v13 }
 0x329   :  { %v416_v15 = vpop.xlane.xlu0 %415 }
 0x32a   :  { %4031 = vpow2.f32 %v419_v14  ;;  %v418_v16 = vsub.f32 %v408_v8, %v416_v15  ;;  %v4330_v14 = vsel %vm593_vm2, 1.0, %v4047_v0  ;;  %v669_v0 = vld [vmem:[%s5213_s9 + $0x100] sm:$0xff] }
 0x32c   :  { %v421_v17 = vmul.f32 1.442695, %v418_v16 }
 0x32e   :  { %4033 = vpow2.f32 %v421_v17 }
 0x334   :  { %v4032_v18 = vpop.eup %4031 }
 0x335   :  { %v423_v19 = vsel %vm58_vm1, %v4032_v18, 0.0 }
 0x336   :  { %424 = vadd.xlane.f32.xlu1 %v423_v19 }
 0x338   :  { %v4034_v20 = vpop.eup %4033 }
 0x339   :  { %v426_v21 = vsel %vm58_vm1, %v4034_v20, 0.0 }
 0x33a   :  { %427 = vadd.xlane.f32.xlu1 %v426_v21  ;;  %v677_v21 = vld [vmem:[%s5213_s9 + $0x140] sm:$0xff] }
 0x33b   :  { %v3366_v23 = vcombine.high %v669_v0, %v677_v21  ;;  %v3365_v25 = vcombine.low %v669_v0, %v677_v21 }
 0x3c3   :  { %v425_v30 = vpop.xlane.xlu1 %424 }
 0x3c4   :  { %4035 = vrcp.f32 %v425_v30  ;;  %v693_v30 = vld [vmem:[%s5213_s9 + $0x1c0] sm:$0xff] }
 0x3c7   :  { %v428_v31 = vpop.xlane.xlu1 %427 }
 0x3c8   :  { %4037 = vrcp.f32 %v428_v31  ;;  %v686_v31 = vld [vmem:[%s5213_s9 + $0x188] sm:$0xff] }
 0x3ce   :  { %v4036_v32 = vpop.eup %4035 }
 0x3cf   :  { %v431_v34 = vmul.f32 %v4036_v32, %v4032_v18  ;;  %v3382_v32 = vcombine.high %v685_v28, %v693_v30 }
 0x3d2   :  { %v4038_v33 = vpop.eup %4037 }
 0x3d3   :  { %v432_v37 = vmul.f32 %v4038_v33, %v4034_v20  ;;  %v694_v33 = vld [vmem:[%s5213_s9 + $0x1c8] sm:$0xff] }
 0x3d5   :  { %v433_v38 = vpack.c.bf16 %v432_v37, %v431_v34  ;;  %v3381_v34 = vcombine.low %v685_v28, %v693_v30  ;;  %v3383_v37 = vcombine.low %v686_v31, %v694_v33 }
 0x3d7   :  { %3836 = vmatmul.mubr.msk.bf16.vlgmr.msra.gmra.mrb[12].mxu0 %vm58_vm1, %v433_v38  ;;  %v3384_v38 = vcombine.high %v686_v31, %v694_v33  ;;  %v3332_v31 = vld [vmem:[%s5215_s8 + $0x1] ss:$0 sm:$0xff] }
 0x3d8   :  { %1521 = vmatprep.mubr.bf16.mxu0 %v4049_v29  ;;  %1490 = vmatpush1.bf16.msra.mxu0 %v3333_v62  ;;  %v734_v62 = vld [vmem:[%s5213_s9 + $0x308] sm:$0xff] }
 0x4aa   :  { %v471_v45 = vpop.f32.mrb[12].mxu0 }
 0x4ab   :  { %v3837_v46 = vpop.f32.mrb[13].mxu0 }
 0x4ac   :  { %v474_v47 = vpop.f32.mrb[14].mxu0  ;;  %v702_v46 = vld [vmem:[%s5213_s9 + $0x208] sm:$0xff] }
 0x4ad   :  { %v478_v48 = vpack.c.bf16 %v474_v47, %v471_v45  ;;  %v3838_v49 = vpop.f32.mrb[15].mxu0  ;;  %v709_v45 = vld [vmem:[%s5213_s9 + $0x240] sm:$0xff] }
 0x4ae   :  { %v3398_v47 = vcombine.high %v701_v43, %v709_v45  ;;  %v3397_v49 = vcombine.low %v701_v43, %v709_v45 }
 0x4af   :  { %3856 = vmatmul.mubr.bf16.vlgmr.msra.gmra.mrb[4].mxu1 %v478_v48  ;;  %v710_v48 = vld [vmem:[%s5213_s9 + $0x248] sm:$0xff] }
 0x4b0   :  { %1564 = vmatprep.mubr.bf16.mxu1 %v4049_v29 }
 0x582   :  { %v584_v51 = vpop.f32.mrb[4].mxu1 }
 0x583   :  { %v585_v52 = vadd.f32 %v3321_v50, %v584_v51  ;;  %v3857_v53 = vpop.f32.mrb[5].mxu1  ;;  %v3400_v51 = vcombine.high %v702_v46, %v710_v48 }
 0x584   :  { %v587_v54 = vpop.f32.mrb[6].mxu1  ;;  %v725_v53 = vld [vmem:[%s5213_s9 + $0x2c0] sm:$0xff] }
 0x585   :  { %v588_v55 = vadd.f32 %v3321_v50, %v587_v54  ;;  %v3858_v56 = vpop.f32.mrb[7].mxu1  ;;  %v596_v57 = vadd.f32 %v585_v52, %v4224_v35  ;;  %v646_v35 = vld [vmem:[%s5213_s9 + $0x48] sm:$0xff]  ;;  %v3399_v50 = vcombine.low %v702_v46, %v710_v48  ;;  %v717_v52 = vld [vmem:[%s5213_s9 + $0x280] sm:$0xff]  ;;  %v671_v46 = vld [vmem:[%s5213_s9 + $0x110] sm:$0xff] }
 0x586   :  { %v3335_v2 = vcombine.low %v638_v61, %v646_v35  ;;  %v3336_v3 = vcombine.high %v638_v61, %v646_v35  ;;  %v718_v54 = vld [vmem:[%s5213_s9 + $0x288] sm:$0xff]  ;;  %v741_v61 = vld [vmem:[%s5213_s9 + $0x340] sm:$0xff]  ;;  %v672_v48 = vld [vmem:[%s5213_s9 + $0x118] sm:$0xff] }
 0x587   :  { %600 = vadd.xlane.f32.xlu0 %v596_v57  ;;  %v597_v58 = vadd.f32 %v588_v55, %v4226_v36  ;;  %v653_v36 = vld [vmem:[%s5213_s9 + $0x80] sm:$0xff]  ;;  %v3414_v55 = vcombine.high %v717_v52, %v725_v53  ;;  %v726_v56 = vld [vmem:[%s5213_s9 + $0x2c8] sm:$0xff]  ;;  %v3430_v63 = vcombine.high %v733_v60, %v741_v61 }
 0x588   :  { %v3350_v4 = vcombine.high %v653_v36, %v661_v1  ;;  %1532 = vmatprep.subr.bf16.mxu1 %v3336_v3  ;;  %v3349_v8 = vcombine.low %v653_v36, %v661_v1  ;;  %v3416_v59 = vcombine.high %v718_v54, %v726_v56  ;;  %v742_v35 = vld [vmem:[%s5213_s9 + $0x348] sm:$0xff]  ;;  %v3429_v36 = vcombine.low %v733_v60, %v741_v61  ;;  %v749_v3 = vld [vmem:[%s5213_s9 + $0x380] sm:$0xff] }
 0x589   :  { %602 = vadd.xlane.f32.xlu1 %v597_v58  ;;  %1533 = vmatpush1.bf16.msra.mxu1 %v3335_v2  ;;  %v3431_v1 = vcombine.low %v734_v62, %v742_v35  ;;  %v3432_v2 = vcombine.high %v734_v62, %v742_v35  ;;  %v711_v35 = vld [vmem:[%s5213_s9 + $0x250] sm:$0xff] }
 0x58a   :  { %1491 = vmatprep.subr.bf16.mxu0 %v3350_v4  ;;  %1534 = vmatprep.subr.bf16.mxu1 %v3352_v7  ;;  %v757_v4 = vld [vmem:[%s5213_s9 + $0x3c0] sm:$0xff]  ;;  %v758_v7 = vld [vmem:[%s5213_s9 + $0x3c8] sm:$0xff] }
 0x58b   :  { %1492 = vmatpush1.bf16.msra.mxu0 %v3349_v8  ;;  %v3446_v6 = vcombine.high %v749_v3, %v757_v4  ;;  %v3445_v8 = vcombine.low %v749_v3, %v757_v4  ;;  %v3448_v10 = vcombine.high %v750_v5, %v758_v7 }
 0x58c   :  { %1493 = vmatprep.subr.bf16.mxu0 %v3366_v23 }
 0x58d   :  { %1535 = vmatpush1.bf16.msra.mxu1 %v3351_v9  ;;  %v3447_v9 = vcombine.low %v750_v5, %v758_v7  ;;  %v727_v7 = vld [vmem:[%s5213_s9 + $0x2d0] sm:$0xff] }
 0x58e   :  { %1536 = vmatprep.subr.bf16.mxu1 %v3368_v27  ;;  %v3331_v27 = vld [vmem:[%s5215_s8] ss:$0 sm:$0xff] }
 0x58f   :  { %1494 = vmatpush1.bf16.msra.mxu0 %v3365_v25 }
 0x590   :  { %1495 = vmatprep.subr.bf16.mxu0 %v3382_v32 }
 0x591   :  { %1537 = vmatpush1.bf16.msra.mxu1 %v3367_v26 }
 0x592   :  { %1538 = vmatprep.subr.bf16.mxu1 %v3384_v38  ;;  %v664_v38 = vld [vmem:[%s5213_s9 + $0xd8] sm:$0xff] }
 0x593   :  { %1496 = vmatpush1.bf16.msra.mxu0 %v3381_v34  ;;  %v655_v34 = vld [vmem:[%s5213_s9 + $0x90] sm:$0xff] }
 0x594   :  { %1497 = vmatprep.subr.bf16.mxu0 %v3398_v47  ;;  %v679_v47 = vld [vmem:[%s5213_s9 + $0x150] sm:$0xff] }
 0x595   :  { %1539 = vmatpush1.bf16.msra.mxu1 %v3383_v37  ;;  %v663_v37 = vld [vmem:[%s5213_s9 + $0xd0] sm:$0xff]  ;;  %v3369_v61 = vcombine.low %v671_v46, %v679_v47 }
 0x596   :  { %1540 = vmatprep.subr.bf16.mxu1 %v3400_v51  ;;  %v3354_v51 = vcombine.high %v655_v34, %v663_v37 }
 0x597   :  { %1498 = vmatpush1.bf16.msra.mxu0 %v3397_v49  ;;  %v680_v49 = vld [vmem:[%s5213_s9 + $0x158] sm:$0xff] }
 0x598   :  { %1499 = vmatprep.subr.bf16.mxu0 %v3414_v55  ;;  %v687_v55 = vld [vmem:[%s5213_s9 + $0x190] sm:$0xff]  ;;  %v3372_v60 = vcombine.high %v672_v48, %v680_v49  ;;  %v3371_v62 = vcombine.low %v672_v48, %v680_v49  ;;  %v665_v48 = vld [vmem:[%s5213_s9 + $0xe0] sm:$0xff]  ;;  %v658_v49 = vld [vmem:[%s5213_s9 + $0xa8] sm:$0xff] }
 0x599   :  { %1541 = vmatpush1.bf16.msra.mxu1 %v3399_v50 }
 0x59a   :  { %1542 = vmatprep.subr.bf16.mxu1 %v3416_v59  ;;  %v3370_v59 = vcombine.high %v671_v46, %v679_v47  ;;  %v657_v47 = vld [vmem:[%s5213_s9 + $0xa0] sm:$0xff] }
 0x614   :  { %v601_v11 = vpop.xlane.xlu0 %600 }
 0x615   :  { %v604_v12 = vmul.f32 0.03125, %v601_v11  ;;  %v639_v11 = vld [vmem:[%s5213_s9 + $0x10] sm:$0xff] }
 0x616   :  { %v603_v13 = vpop.xlane.xlu1 %602 }
 0x617   :  { %v606_v15 = vsub.f32 %v596_v57, %v604_v12  ;;  %v605_v16 = vmul.f32 0.03125, %v603_v13  ;;  %v3413_v57 = vcombine.low %v717_v52, %v725_v53  ;;  %v647_v12 = vld [vmem:[%s5213_s9 + $0x50] sm:$0xff]  ;;  %v640_v13 = vld [vmem:[%s5213_s9 + $0x18] sm:$0xff]  ;;  %v3353_v53 = vcombine.low %v655_v34, %v663_v37  ;;  %v642_v34 = vld [vmem:[%s5213_s9 + $0x28] sm:$0xff] }
 0x618   :  { %v650_v37 = vld [vmem:[%s5213_s9 + $0x68] sm:$0xff] }
 0x619   :  { %v607_v17 = vsub.f32 %v597_v58, %v605_v16  ;;  %v4333_v18 = vmul.f32 %v4330_v14, %v606_v15  ;;  %v3415_v58 = vcombine.low %v718_v54, %v726_v56  ;;  %1500 = vmatpush1.bf16.msra.mxu0 %v3413_v57  ;;  %v3338_v15 = vcombine.high %v639_v11, %v647_v12  ;;  %v648_v16 = vld [vmem:[%s5213_s9 + $0x58] sm:$0xff]  ;;  %v695_v56 = vld [vmem:[%s5213_s9 + $0x1d0] sm:$0xff] }
 0x61a   :  { %1501 = vmatprep.subr.bf16.mxu0 %v3430_v63  ;;  %v688_v57 = vld [vmem:[%s5213_s9 + $0x198] sm:$0xff]  ;;  %v703_v63 = vld [vmem:[%s5213_s9 + $0x210] sm:$0xff]  ;;  %v3385_v4 = vcombine.low %v687_v55, %v695_v56 }
 0x61b   :  { %v610_v19 = vmul.f32 %v4333_v18, %v4333_v18  ;;  %v4338_v20 = vmul.f32 %v4330_v14, %v607_v17  ;;  %1543 = vmatpush1.bf16.msra.mxu1 %v3415_v58  ;;  %v3337_v17 = vcombine.low %v639_v11, %v647_v12  ;;  %v696_v58 = vld [vmem:[%s5213_s9 + $0x1d8] sm:$0xff]  ;;  %v3401_v12 = vcombine.low %v703_v63, %v711_v35 }
 0x61c   :  { %1544 = vmatprep.subr.bf16.mxu1 %v3432_v2  ;;  %v3386_v2 = vcombine.high %v687_v55, %v695_v56  ;;  %v3388_v3 = vcombine.high %v688_v57, %v696_v58  ;;  %v3387_v5 = vcombine.low %v688_v57, %v696_v58  ;;  %v3343_v55 = vcombine.low %v642_v34, %v650_v37  ;;  %v673_v56 = vld [vmem:[%s5213_s9 + $0x120] sm:$0xff]  ;;  %v674_v58 = vld [vmem:[%s5213_s9 + $0x128] sm:$0xff] }
 0x61d   :  { %612 = vadd.xlane.f32.xlu0 %v610_v19  ;;  %v611_v39 = vmul.f32 %v4338_v20, %v4338_v20  ;;  %1502 = vmatpush1.bf16.msra.mxu0 %v3429_v36  ;;  %v3339_v19 = vcombine.low %v640_v13, %v648_v16  ;;  %v704_v36 = vld [vmem:[%s5213_s9 + $0x218] sm:$0xff]  ;;  %v681_v57 = vld [vmem:[%s5213_s9 + $0x160] sm:$0xff] }
 0x61e   :  { %1503 = vmatprep.subr.bf16.mxu0 %v3446_v6  ;;  %v719_v6 = vld [vmem:[%s5213_s9 + $0x290] sm:$0xff] }
 0x61f   :  { %614 = vadd.xlane.f32.xlu1 %v611_v39  ;;  %1545 = vmatpush1.bf16.msra.mxu1 %v3431_v1  ;;  %v3340_v39 = vcombine.high %v640_v13, %v648_v16  ;;  %v712_v1 = vld [vmem:[%s5213_s9 + $0x258] sm:$0xff]  ;;  %v743_v16 = vld [vmem:[%s5213_s9 + $0x350] sm:$0xff] }
 0x620   :  { %1546 = vmatprep.subr.bf16.mxu1 %v3448_v10  ;;  %v3402_v10 = vcombine.high %v703_v63, %v711_v35  ;;  %v3404_v11 = vcombine.high %v704_v36, %v712_v1  ;;  %v3403_v13 = vcombine.low %v704_v36, %v712_v1  ;;  %v689_v35 = vld [vmem:[%s5213_s9 + $0x1a0] sm:$0xff]  ;;  %v690_v1 = vld [vmem:[%s5213_s9 + $0x1a8] sm:$0xff] }
 0x621   :  { %1504 = vmatpush1.bf16.msra.mxu0 %v3445_v8  ;;  %v720_v8 = vld [vmem:[%s5213_s9 + $0x298] sm:$0xff]  ;;  %v697_v36 = vld [vmem:[%s5213_s9 + $0x1e0] sm:$0xff] }
 0x622   :  { %1575 = vmatprep.subr.bf16.mxu0 %v3338_v15  ;;  %v735_v15 = vld [vmem:[%s5213_s9 + $0x310] sm:$0xff] }
 0x623   :  { %1547 = vmatpush1.bf16.msra.mxu1 %v3447_v9  ;;  %v728_v9 = vld [vmem:[%s5213_s9 + $0x2d8] sm:$0xff] }
 0x624   :  { %1618 = vmatprep.subr.bf16.mxu1 %v3340_v39  ;;  %v3418_v39 = vcombine.high %v719_v6, %v727_v7 }
 0x6aa   :  { %v613_v0 = vpop.xlane.xlu0 %612 }
 0x6ab   :  { %v616_v21 = vmul.f32 0.03125, %v613_v0  ;;  %v3420_v0 = vcombine.high %v720_v8, %v728_v9 }
 0x6ac   :  { %v615_v22 = vpop.xlane.xlu1 %614 }
 0x6ad   :  { %v618_v23 = vadd.f32 1e-05, %v616_v21  ;;  %v617_v24 = vmul.f32 0.03125, %v615_v22  ;;  %v3417_v21 = vcombine.low %v719_v6, %v727_v7  ;;  %v3419_v22 = vcombine.low %v720_v8, %v728_v9  ;;  %v705_v7 = vld [vmem:[%s5213_s9 + $0x220] sm:$0xff]  ;;  %v706_v9 = vld [vmem:[%s5213_s9 + $0x228] sm:$0xff] }
 0x6ae   :  { %v713_v8 = vld [vmem:[%s5213_s9 + $0x260] sm:$0xff] }
 0x6af   :  { %4039 = vrsqrt.f32 %v618_v23  ;;  %v619_v25 = vadd.f32 1e-05, %v617_v24  ;;  %v751_v23 = vld [vmem:[%s5213_s9 + $0x390] sm:$0xff] }
 0x6b0   :  { %v759_v24 = vld [vmem:[%s5213_s9 + $0x3d0] sm:$0xff] }
 0x6b1   :  { %4041 = vrsqrt.f32 %v619_v25  ;;  %v752_v25 = vld [vmem:[%s5213_s9 + $0x398] sm:$0xff] }
 0x6b9   :  { %v4040_v26 = vpop.eup %4039 }
 0x6ba   :  { %v622_v28 = vmul.f32 %v4040_v26, %v4333_v18  ;;  %v656_v18 = vld [vmem:[%s5213_s9 + $0x98] sm:$0xff] }
 0x6bb   :  { %v4042_v30 = vpop.eup %4041  ;;  %v3356_v52 = vcombine.high %v656_v18, %v664_v38  ;;  %v3355_v54 = vcombine.low %v656_v18, %v664_v38  ;;  %v760_v26 = vld [vmem:[%s5213_s9 + $0x3d8] sm:$0xff]  ;;  %v3450_v18 = vcombine.high %v751_v23, %v759_v24 }
 0x6bc   :  { %v628_v32 = vmul.f32 %v3331_v27, %v622_v28  ;;  %v623_v33 = vmul.f32 %v4042_v30, %v4338_v20  ;;  %v3433_v30 = vcombine.low %v735_v15, %v743_v16  ;;  %v3452_v38 = vcombine.high %v752_v25, %v760_v26 }
 0x6bd   :  { %v3451_v46 = vcombine.low %v752_v25, %v760_v26  ;;  %v745_v25 = vld [vmem:[%s5213_s9 + $0x360] sm:$0xff]  ;;  %v738_v26 = vld [vmem:[%s5213_s9 + $0x328] sm:$0xff] }
 0x6be   :  { %v629_v43 = vmul.f32 %v3331_v27, %v623_v33  ;;  %v4446_v45 = vadd.f32 %v3332_v31, %v628_v32  ;;  %v3434_v27 = vcombine.high %v735_v15, %v743_v16  ;;  %v641_v32 = vld [vmem:[%s5213_s9 + $0x20] sm:$0xff] }
 0x6bf   :  { %v649_v33 = vld [vmem:[%s5213_s9 + $0x60] sm:$0xff] }
 0x6c0   :  { %v4448_v20 = vadd.f32 %v3332_v31, %v629_v43  ;;  %v3449_v43 = vcombine.low %v751_v23, %v759_v24  ;;  %v721_v16 = vld [vmem:[%s5213_s9 + $0x2a0] sm:$0xff] }
 0x6c1   :  { %v737_v24 = vld [vmem:[%s5213_s9 + $0x320] sm:$0xff] }
 0x6c2   :  { %v4464_v50 = vpack.c.bf16 %v4448_v20, %v4446_v45 }
 0x6c4   :  { %1522 = vmatmul.mubr.bf16.vlgmr.msra.gmra.mrb[16].mxu0 %v4464_v50  ;;  %1565 = vmatmul.mubr.bf16.vlgmr.msra.gmra.mrb[8].mxu1 %v4464_v50 }
 0x6c5   :  { %1576 = vmatpush1.bf16.msra.mxu0 %v3337_v17  ;;  %1619 = vmatpush1.bf16.msra.mxu1 %v3339_v19  ;;  %v736_v17 = vld [vmem:[%s5213_s9 + $0x318] sm:$0xff] }
 0x6c6   :  { %1577 = vmatprep.subr.bf16.mxu0 %v3354_v51  ;;  %1620 = vmatprep.subr.bf16.mxu1 %v3356_v52  ;;  %v744_v19 = vld [vmem:[%s5213_s9 + $0x358] sm:$0xff]  ;;  %v666_v51 = vld [vmem:[%s5213_s9 + $0xe8] sm:$0xff]  ;;  %v3342_v52 = vcombine.high %v641_v32, %v649_v33 }
 0x6c7   :  { %1607 = vmatprep.mubr.bf16.mxu0 %v4049_v29  ;;  %1650 = vmatprep.mubr.bf16.mxu1 %v4049_v29  ;;  %v3436_v28 = vcombine.high %v736_v17, %v744_v19  ;;  %v3435_v31 = vcombine.low %v736_v17, %v744_v19  ;;  %v3359_v63 = vcombine.low %v658_v49, %v666_v51  ;;  %v729_v17 = vld [vmem:[%s5213_s9 + $0x2e0] sm:$0xff]  ;;  %v722_v19 = vld [vmem:[%s5213_s9 + $0x2a8] sm:$0xff] }
 0x6c9   :  { %1578 = vmatpush1.bf16.msra.mxu0 %v3353_v53  ;;  %1621 = vmatpush1.bf16.msra.mxu1 %v3355_v54  ;;  %v3344_v53 = vcombine.high %v642_v34, %v650_v37  ;;  %v3341_v54 = vcombine.low %v641_v32, %v649_v33  ;;  %v753_v33 = vld [vmem:[%s5213_s9 + $0x3a0] sm:$0xff]  ;;  %v754_v37 = vld [vmem:[%s5213_s9 + $0x3a8] sm:$0xff] }
 0x6ca   :  { %1579 = vmatprep.subr.bf16.mxu0 %v3370_v59  ;;  %1622 = vmatprep.subr.bf16.mxu1 %v3372_v60  ;;  %v682_v59 = vld [vmem:[%s5213_s9 + $0x168] sm:$0xff]  ;;  %v3358_v60 = vcombine.high %v657_v47, %v665_v48  ;;  %v761_v34 = vld [vmem:[%s5213_s9 + $0x3e0] sm:$0xff] }
 0x6cb   :  { %v3375_v6 = vcombine.low %v674_v58, %v682_v59 }
 0x6cd   :  { %1580 = vmatpush1.bf16.msra.mxu0 %v3369_v61  ;;  %1623 = vmatpush1.bf16.msra.mxu1 %v3371_v62  ;;  %v3360_v61 = vcombine.high %v658_v49, %v666_v51  ;;  %v3357_v62 = vcombine.low %v657_v47, %v665_v48  ;;  %v643_v48 = vld [vmem:[%s5213_s9 + $0x30] sm:$0xff]  ;;  %v644_v51 = vld [vmem:[%s5213_s9 + $0x38] sm:$0xff] }
 0x6ce   :  { %1581 = vmatprep.subr.bf16.mxu0 %v3386_v2  ;;  %1624 = vmatprep.subr.bf16.mxu1 %v3388_v3  ;;  %v698_v2 = vld [vmem:[%s5213_s9 + $0x1e8] sm:$0xff]  ;;  %v3374_v3 = vcombine.high %v673_v56, %v681_v57  ;;  %v651_v49 = vld [vmem:[%s5213_s9 + $0x70] sm:$0xff] }
 0x6cf   :  { %v3391_v15 = vcombine.low %v690_v1, %v698_v2 }
 0x6d1   :  { %1582 = vmatpush1.bf16.msra.mxu0 %v3385_v4  ;;  %1625 = vmatpush1.bf16.msra.mxu1 %v3387_v5  ;;  %v3376_v4 = vcombine.high %v674_v58, %v682_v59  ;;  %v3373_v5 = vcombine.low %v673_v56, %v681_v57  ;;  %v659_v57 = vld [vmem:[%s5213_s9 + $0xb0] sm:$0xff]  ;;  %v660_v59 = vld [vmem:[%s5213_s9 + $0xb8] sm:$0xff] }
 0x6d2   :  { %1583 = vmatprep.subr.bf16.mxu0 %v3402_v10  ;;  %1626 = vmatprep.subr.bf16.mxu1 %v3404_v11  ;;  %v714_v10 = vld [vmem:[%s5213_s9 + $0x268] sm:$0xff]  ;;  %v3390_v11 = vcombine.high %v689_v35, %v697_v36  ;;  %v667_v58 = vld [vmem:[%s5213_s9 + $0xf0] sm:$0xff] }
 0x6d3   :  { %v3407_v23 = vcombine.low %v706_v9, %v714_v10 }
 0x6d5   :  { %1584 = vmatpush1.bf16.msra.mxu0 %v3401_v12  ;;  %1627 = vmatpush1.bf16.msra.mxu1 %v3403_v13  ;;  %v3392_v12 = vcombine.high %v690_v1, %v698_v2  ;;  %v3389_v13 = vcombine.low %v689_v35, %v697_v36  ;;  %v675_v36 = vld [vmem:[%s5213_s9 + $0x130] sm:$0xff]  ;;  %v3362_v1 = vcombine.high %v659_v57, %v667_v58 }
 0x6d6   :  { %1585 = vmatprep.subr.bf16.mxu0 %v3418_v39  ;;  %1628 = vmatprep.subr.bf16.mxu1 %v3420_v0  ;;  %v730_v39 = vld [vmem:[%s5213_s9 + $0x2e8] sm:$0xff]  ;;  %v3406_v0 = vcombine.high %v705_v7, %v713_v8 }
 0x6d7   :  { %v3423_v32 = vcombine.low %v722_v19, %v730_v39 }
 0x6d9   :  { %1586 = vmatpush1.bf16.msra.mxu0 %v3417_v21  ;;  %1629 = vmatpush1.bf16.msra.mxu1 %v3419_v22  ;;  %v3408_v21 = vcombine.high %v706_v9, %v714_v10  ;;  %v3405_v22 = vcombine.low %v705_v7, %v713_v8  ;;  %v691_v10 = vld [vmem:[%s5213_s9 + $0x1b0] sm:$0xff] }
 0x6da   :  { %1587 = vmatprep.subr.bf16.mxu0 %v3434_v27  ;;  %1630 = vmatprep.subr.bf16.mxu1 %v3436_v28  ;;  %v746_v27 = vld [vmem:[%s5213_s9 + $0x368] sm:$0xff]  ;;  %v3422_v28 = vcombine.high %v721_v16, %v729_v17 }
 0x6db   :  { %v3439_v47 = vcombine.low %v738_v26, %v746_v27 }
 0x6dd   :  { %1588 = vmatpush1.bf16.msra.mxu0 %v3433_v30  ;;  %1631 = vmatpush1.bf16.msra.mxu1 %v3435_v31  ;;  %v3424_v30 = vcombine.high %v722_v19, %v730_v39  ;;  %v3421_v31 = vcombine.low %v721_v16, %v729_v17  ;;  %v707_v39 = vld [vmem:[%s5213_s9 + $0x230] sm:$0xff] }
 0x6de   :  { %1589 = vmatprep.subr.bf16.mxu0 %v3450_v18  ;;  %1632 = vmatprep.subr.bf16.mxu1 %v3452_v38  ;;  %v762_v18 = vld [vmem:[%s5213_s9 + $0x3e8] sm:$0xff]  ;;  %v3438_v38 = vcombine.high %v737_v24, %v745_v25 }
 0x6df   :  { %v3455_v56 = vcombine.low %v754_v37, %v762_v18 }
 0x6e1   :  { %1590 = vmatpush1.bf16.msra.mxu0 %v3449_v43  ;;  %1633 = vmatpush1.bf16.msra.mxu1 %v3451_v46  ;;  %v3440_v43 = vcombine.high %v738_v26, %v746_v27  ;;  %v3437_v46 = vcombine.low %v737_v24, %v745_v25  ;;  %v723_v26 = vld [vmem:[%s5213_s9 + $0x2b0] sm:$0xff] }
 0x6e2   :  { %1661 = vmatprep.subr.bf16.mxu0 %v3342_v52  ;;  %1704 = vmatprep.subr.bf16.mxu1 %v3344_v53  ;;  %v652_v52 = vld [vmem:[%s5213_s9 + $0x78] sm:$0xff]  ;;  %v3454_v53 = vcombine.high %v753_v33, %v761_v34  ;;  %v731_v27 = vld [vmem:[%s5213_s9 + $0x2f0] sm:$0xff] }
 0x6e3   :  { %v3347_v35 = vcombine.low %v644_v51, %v652_v52 }
 0x6e4   :  { %1608 = vmatmul.mubr.bf16.vlgmr.msra.gmra.mrb[20].mxu0 %v4464_v50  ;;  %1651 = vmatmul.mubr.bf16.vlgmr.msra.gmra.mrb[12].mxu1 %v4464_v50 }
 0x6e5   :  { %1662 = vmatpush1.bf16.msra.mxu0 %v3341_v54  ;;  %1705 = vmatpush1.bf16.msra.mxu1 %v3343_v55  ;;  %v3456_v54 = vcombine.high %v754_v37, %v762_v18  ;;  %v3453_v55 = vcombine.low %v753_v33, %v761_v34  ;;  %v3426_v33 = vcombine.high %v723_v26, %v731_v27  ;;  %v739_v37 = vld [vmem:[%s5213_s9 + $0x330] sm:$0xff] }
 0x6e6   :  { %1663 = vmatprep.subr.bf16.mxu0 %v3358_v60  ;;  %1706 = vmatprep.subr.bf16.mxu1 %v3360_v61  ;;  %v668_v60 = vld [vmem:[%s5213_s9 + $0xf8] sm:$0xff]  ;;  %v3346_v61 = vcombine.high %v643_v48, %v651_v49  ;;  %v747_v18 = vld [vmem:[%s5213_s9 + $0x370] sm:$0xff] }
 0x6e7   :  { %1693 = vmatprep.mubr.bf16.mxu0 %v4049_v29  ;;  %1736 = vmatprep.mubr.bf16.mxu1 %v4049_v29  ;;  %v3364_v2 = vcombine.high %v660_v59, %v668_v60  ;;  %v3363_v7 = vcombine.low %v660_v59, %v668_v60 }
 0x6e9   :  { %1664 = vmatpush1.bf16.msra.mxu0 %v3357_v62  ;;  %1707 = vmatpush1.bf16.msra.mxu1 %v3359_v63  ;;  %v3348_v62 = vcombine.high %v644_v51, %v652_v52  ;;  %v3345_v63 = vcombine.low %v643_v48, %v651_v49  ;;  %v3442_v48 = vcombine.high %v739_v37, %v747_v18  ;;  %v755_v51 = vld [vmem:[%s5213_s9 + $0x3b0] sm:$0xff] }
 0x6ea   :  { %1665 = vmatprep.subr.bf16.mxu0 %v3374_v3  ;;  %1708 = vmatprep.subr.bf16.mxu1 %v3376_v4  ;;  %v683_v3 = vld [vmem:[%s5213_s9 + $0x170] sm:$0xff]  ;;  %v676_v4 = vld [vmem:[%s5213_s9 + $0x138] sm:$0xff] }
 0x6eb   :  { %v3378_v8 = vcombine.high %v675_v36, %v683_v3  ;;  %v763_v52 = vld [vmem:[%s5213_s9 + $0x3f0] sm:$0xff] }
 0x6ec   :  { %v3457_v59 = vcombine.low %v755_v51, %v763_v52 }
 0x6ed   :  { %1666 = vmatpush1.bf16.msra.mxu0 %v3373_v5  ;;  %1709 = vmatpush1.bf16.msra.mxu1 %v3375_v6  ;;  %v684_v5 = vld [vmem:[%s5213_s9 + $0x178] sm:$0xff]  ;;  %v3361_v6 = vcombine.low %v659_v57, %v667_v58  ;;  %v3458_v57 = vcombine.high %v755_v51, %v763_v52 }
 0x6ee   :  { %1667 = vmatprep.subr.bf16.mxu0 %v3390_v11  ;;  %1710 = vmatprep.subr.bf16.mxu1 %v3392_v12  ;;  %v3380_v9 = vcombine.high %v676_v4, %v684_v5  ;;  %v699_v11 = vld [vmem:[%s5213_s9 + $0x1f0] sm:$0xff]  ;;  %v692_v12 = vld [vmem:[%s5213_s9 + $0x1b8] sm:$0xff]  ;;  %v3379_v16 = vcombine.low %v676_v4, %v684_v5 }
 0x6ef   :  { %v3394_v17 = vcombine.high %v691_v10, %v699_v11  ;;  %v3911_v4 = vld [vmem:[%s5214_s11 + $0x50] sm:$0xff]  }
 0x6f0   :  { %v3913_v5 = vld [vmem:[%s5214_s11 + $0x10] sm:$0xff]  }
 0x6f1   :  { %1668 = vmatpush1.bf16.msra.mxu0 %v3389_v13  ;;  %1711 = vmatpush1.bf16.msra.mxu1 %v3391_v15  ;;  %v700_v13 = vld [vmem:[%s5213_s9 + $0x1f8] sm:$0xff]  ;;  %v3377_v15 = vcombine.low %v675_v36, %v683_v3  ;;  %v3907_v36 = vld [vmem:[%s5214_s11 + $0x48] sm:$0xff]  }
 0x6f2   :  { %1669 = vmatprep.subr.bf16.mxu0 %v3406_v0  ;;  %1712 = vmatprep.subr.bf16.mxu1 %v3408_v21  ;;  %v3396_v19 = vcombine.high %v692_v12, %v700_v13  ;;  %v715_v0 = vld [vmem:[%s5213_s9 + $0x270] sm:$0xff]  ;;  %v716_v21 = vld [vmem:[%s5213_s9 + $0x278] sm:$0xff]  ;;  %v3910_v3 = vld [vmem:[%s5214_s11 + $0x88] sm:$0xff]  }
 0x6f3   :  { %v3410_v24 = vcombine.high %v707_v39, %v715_v0 }
 0x6f5   :  { %1670 = vmatpush1.bf16.msra.mxu0 %v3405_v22  ;;  %1713 = vmatpush1.bf16.msra.mxu1 %v3407_v23  ;;  %v3393_v22 = vcombine.low %v691_v10, %v699_v11  ;;  %v3395_v23 = vcombine.low %v692_v12, %v700_v13  ;;  %v3918_v10 = vld [vmem:[%s5214_s11 + $0x98] sm:$0xff]   ;;  %v3919_v11 = vld [vmem:[%s5214_s11 + $0x60] sm:$0xff]  }
 0x6f6   :  { %1671 = vmatprep.subr.bf16.mxu0 %v3422_v28  ;;  %1714 = vmatprep.subr.bf16.mxu1 %v3424_v30  ;;  %v724_v28 = vld [vmem:[%s5213_s9 + $0x2b8] sm:$0xff]  ;;  %v3920_v12 = vld [vmem:[%s5214_s11 + $0xe0] sm:$0xff]  }
 0x6f7   :  { %v732_v30 = vld [vmem:[%s5213_s9 + $0x2f8] sm:$0xff]  ;;  %v3921_v13 = vld [vmem:[%s5214_s11 + $0x20] sm:$0xff]  }
 0x6f8   :  { %v3428_v34 = vcombine.high %v724_v28, %v732_v30 }
 0x6f9   :  { %1672 = vmatpush1.bf16.msra.mxu0 %v3421_v31  ;;  %1715 = vmatpush1.bf16.msra.mxu1 %v3423_v32  ;;  %v3409_v31 = vcombine.low %v707_v39, %v715_v0  ;;  %v3926_v39 = vld [vmem:[%s5214_s11 + $0xa8] sm:$0xff]   ;;  %v3927_v0 = vld [vmem:[%s5214_s11 + $0x70] sm:$0xff]  }
 0x6fa   :  { %1673 = vmatprep.subr.bf16.mxu0 %v3438_v38  ;;  %1716 = vmatprep.subr.bf16.mxu1 %v3440_v43  ;;  %v740_v38 = vld [vmem:[%s5213_s9 + $0x338] sm:$0xff] }
 0x6fb   :  { %v748_v43 = vld [vmem:[%s5213_s9 + $0x378] sm:$0xff] }
 0x6fc   :  { %v3444_v49 = vcombine.high %v740_v38, %v748_v43 }
 0x6fd   :  { %1674 = vmatpush1.bf16.msra.mxu0 %v3437_v46  ;;  %1717 = vmatpush1.bf16.msra.mxu1 %v3439_v47  ;;  %v3425_v46 = vcombine.low %v723_v26, %v731_v27  ;;  %v3427_v47 = vcombine.low %v724_v28, %v732_v30  ;;  %v3934_v26 = vld [vmem:[%s5214_s11 + $0xb8] sm:$0xff]   ;;  %v3935_v27 = vld [vmem:[%s5214_s11 + $0x140] sm:$0xff]   ;;  %v4837_v30 = vld [vmem:[%s5216_s10 + $0x8] sm:$0xff] }
 0x6fe   :  { %1675 = vmatprep.subr.bf16.mxu0 %v3454_v53  ;;  %1718 = vmatprep.subr.bf16.mxu1 %v3456_v54  ;;  %v756_v53 = vld [vmem:[%s5213_s9 + $0x3b8] sm:$0xff]  ;;  %v3936_v28 = vld [vmem:[%s5214_s11 + $0x1c0] sm:$0xff]  }
 0x6ff   :  { %v764_v54 = vld [vmem:[%s5213_s9 + $0x3f8] sm:$0xff] }
 0x700   :  { %v3460_v58 = vcombine.high %v756_v53, %v764_v54  ;;  %v3459_v60 = vcombine.low %v756_v53, %v764_v54 }
 0x701   :  { %1676 = vmatpush1.bf16.msra.mxu0 %v3453_v55  ;;  %1719 = vmatpush1.bf16.msra.mxu1 %v3455_v56  ;;  %v3441_v55 = vcombine.low %v739_v37, %v747_v18  ;;  %v3443_v56 = vcombine.low %v740_v38, %v748_v43  ;;  %v791_v18 = vsub.s32 5, %v4235_v40  ;;  %v799_v38 = vsub.s32 7, %v4235_v40 }
 0x702   :  { %1747 = vmatprep.subr.bf16.mxu0 %v3346_v61  ;;  %1790 = vmatprep.subr.bf16.mxu1 %v3348_v62  ;;  %v3903_v61 = vld [vmem:[%s5214_s11 + $0x40] sm:$0xff]  }
 0x703   :  { %v3904_v62 = vld [vmem:[%s5214_s11 + $0xc0] sm:$0xff]  }
 0x704   :  { %1694 = vmatmul.mubr.bf16.vlgmr.msra.gmra.mrb[24].mxu0 %v4464_v50  ;;  %1737 = vmatmul.mubr.bf16.vlgmr.msra.gmra.mrb[16].mxu1 %v4464_v50 }
 0x705   :  { %1748 = vmatpush1.bf16.msra.mxu0 %v3345_v63  ;;  %1791 = vmatpush1.bf16.msra.mxu1 %v3347_v35  ;;  %v3905_v63 = vld [vmem:[%s5214_s11] sm:$0xff]  }
 0x706   :  { %1749 = vmatprep.subr.bf16.mxu0 %v3362_v1  ;;  %1792 = vmatprep.subr.bf16.mxu1 %v3364_v2  ;;  %v3906_v35 = vld [vmem:[%s5214_s11 + $0x80] sm:$0xff]   ;;  %v3908_v1 = vld [vmem:[%s5214_s11 + $0xc8] sm:$0xff]  }
 0x707   :  { %1779 = vmatprep.mubr.bf16.mxu0 %v4049_v29  ;;  %1822 = vmatprep.mubr.bf16.mxu1 %v4049_v29  ;;  %v708_v29 = vld [vmem:[%s5213_s9 + $0x238] sm:$0xff]  ;;  %v3909_v2 = vld [vmem:[%s5214_s11 + $0x8] sm:$0xff]  }
 0x708   :  { %v3412_v25 = vcombine.high %v708_v29, %v716_v21  ;;  %v3411_v32 = vcombine.low %v708_v29, %v716_v21  ;;  %v3928_v29 = vld [vmem:[%s5214_s11 + $0xf0] sm:$0xff]  }
 0x709   :  { %1750 = vmatpush1.bf16.msra.mxu0 %v3361_v6  ;;  %1793 = vmatpush1.bf16.msra.mxu1 %v3363_v7  ;;  %v3914_v6 = vld [vmem:[%s5214_s11 + $0x90] sm:$0xff]   ;;  %v3915_v7 = vld [vmem:[%s5214_s11 + $0x58] sm:$0xff]  }
 0x70a   :  { %1751 = vmatprep.subr.bf16.mxu0 %v3378_v8  ;;  %1794 = vmatprep.subr.bf16.mxu1 %v3380_v9  ;;  %v3916_v8 = vld [vmem:[%s5214_s11 + $0xd8] sm:$0xff]   ;;  %v3929_v21 = vld [vmem:[%s5214_s11 + $0x30] sm:$0xff]  }
 0x70b   :  { %v3917_v9 = vld [vmem:[%s5214_s11 + $0x18] sm:$0xff]  }
 0x70d   :  { %1752 = vmatpush1.bf16.msra.mxu0 %v3377_v15  ;;  %1795 = vmatpush1.bf16.msra.mxu1 %v3379_v16  ;;  %v3922_v15 = vld [vmem:[%s5214_s11 + $0xa0] sm:$0xff]   ;;  %v3923_v16 = vld [vmem:[%s5214_s11 + $0x68] sm:$0xff]  }
 0x70e   :  { %1753 = vmatprep.subr.bf16.mxu0 %v3394_v17  ;;  %1796 = vmatprep.subr.bf16.mxu1 %v3396_v19  ;;  %v3924_v17 = vld [vmem:[%s5214_s11 + $0xe8] sm:$0xff]  }
 0x70f   :  { %v3925_v19 = vld [vmem:[%s5214_s11 + $0x28] sm:$0xff]  }
 0x711   :  { %1754 = vmatpush1.bf16.msra.mxu0 %v3393_v22  ;;  %1797 = vmatpush1.bf16.msra.mxu1 %v3395_v23  ;;  %v3930_v22 = vld [vmem:[%s5214_s11 + $0xb0] sm:$0xff]   ;;  %v3931_v23 = vld [vmem:[%s5214_s11 + $0x78] sm:$0xff]  }
 0x712   :  { %1755 = vmatprep.subr.bf16.mxu0 %v3410_v24  ;;  %1798 = vmatprep.subr.bf16.mxu1 %v3412_v25  ;;  %v3932_v24 = vld [vmem:[%s5214_s11 + $0xf8] sm:$0xff]  }
 0x713   :  { %v3933_v25 = vld [vmem:[%s5214_s11 + $0x38] sm:$0xff]  }
 0x715   :  { %1756 = vmatpush1.bf16.msra.mxu0 %v3409_v31  ;;  %1799 = vmatpush1.bf16.msra.mxu1 %v3411_v32  ;;  %v783_v31 = vsub.s32 3, %v4235_v40 }
 0x716   :  { %1757 = vmatprep.subr.bf16.mxu0 %v3426_v33  ;;  %1800 = vmatprep.subr.bf16.mxu1 %v3428_v34  ;;  %v787_v33 = vsub.s32 4, %v4235_v40  ;;  %v795_v34 = vsub.s32 6, %v4235_v40  ;;  %v3963_v40 = vld [vmem:[%s5214_s11 + $0x178] sm:$0xff]  }
 0x717   :  { %v4841_v32 = vrot.slane %v4837_v30, %v783_v31 }
 0x718   :  { %v4848_v37 = vrot.slane %v4837_v30, %v787_v33  ;;  %v4855_v43 = vrot.slane %v4837_v30, %v795_v34 }
 0x719   :  { %1758 = vmatpush1.bf16.msra.mxu0 %v3425_v46  ;;  %1801 = vmatpush1.bf16.msra.mxu1 %v3427_v47  ;;  %v4860_v46 = vrot.slane %v4837_v30, %v791_v18  ;;  %v4865_v47 = vrot.slane %v4837_v30, %v799_v38 }
 0x71a   :  { %1759 = vmatprep.subr.bf16.mxu0 %v3442_v48  ;;  %1802 = vmatprep.subr.bf16.mxu1 %v3444_v49  ;;  %v4870_v48 = vld [vmem:[%s5216_s10] sm:$0xff] }
 0x71b   :  { %v772_v49 = vrot.slane %v4870_v48, %v4238_v41  ;;  %v780_v51 = vrot.slane %v4870_v48, %v4241_v42  ;;  %v776_v52 = vrot.slane %v4870_v48, %v4247_v44  ;;  %v784_v53 = vrot.slane %v4870_v48, %v783_v31  ;;  %v3950_v31 = vld [vmem:[%s5214_s11 + $0x198] sm:$0xff]  }
 0x71d   :  { %1760 = vmatpush1.bf16.msra.mxu0 %v3441_v55  ;;  %1803 = vmatpush1.bf16.msra.mxu1 %v3443_v56 }
 0x71e   :  { %1761 = vmatprep.subr.bf16.mxu0 %v3458_v57  ;;  %1804 = vmatprep.subr.bf16.mxu1 %v3460_v58 }
 0x721   :  { %1762 = vmatpush1.bf16.msra.mxu0 %v3457_v59  ;;  %1805 = vmatpush1.bf16.msra.mxu1 %v3459_v60 }
 0x722   :  { %3625 = vmatprep.subr.bf16.mxu0 %v3903_v61  ;;  %3647 = vmatprep.subr.bf16.mxu1 %v3904_v62 }
 0x724   :  { %1780 = vmatmul.mubr.bf16.vlgmr.msra.gmra.mrb[28].mxu0 %v4464_v50  ;;  %1823 = vmatmul.mubr.bf16.vlgmr.msra.gmra.mrb[20].mxu1 %v4464_v50  ;;  %v3912_v50 = vld [vmem:[%s5214_s11 + $0xd0] sm:$0xff]  }
 0x725   :  { %3626 = vmatpush3.bf16.msra.mxu0 %v3905_v63  ;;  %3648 = vmatpush3.bf16.msra.mxu1 %v3906_v35 }
 0x726   :  { %3627 = vmatprep.subr.bf16.mxu0 %v3907_v36  ;;  %3649 = vmatprep.subr.bf16.mxu1 %v3908_v1 }
 0x729   :  { %3628 = vmatpush3.bf16.msra.mxu0 %v3909_v2  ;;  %3650 = vmatpush3.bf16.msra.mxu1 %v3910_v3 }
 0x72a   :  { %3629 = vmatprep.subr.bf16.mxu0 %v3911_v4  ;;  %3651 = vmatprep.subr.bf16.mxu1 %v3912_v50 }
 0x72d   :  { %3630 = vmatpush3.bf16.msra.mxu0 %v3913_v5  ;;  %3652 = vmatpush3.bf16.msra.mxu1 %v3914_v6 }
 0x72e   :  { %3631 = vmatprep.subr.bf16.mxu0 %v3915_v7  ;;  %3653 = vmatprep.subr.bf16.mxu1 %v3916_v8 }
 0x731   :  { %3632 = vmatpush3.bf16.msra.mxu0 %v3917_v9  ;;  %3654 = vmatpush3.bf16.msra.mxu1 %v3918_v10 }
 0x732   :  { %3633 = vmatprep.subr.bf16.mxu0 %v3919_v11  ;;  %3655 = vmatprep.subr.bf16.mxu1 %v3920_v12 }
 0x735   :  { %3634 = vmatpush3.bf16.msra.mxu0 %v3921_v13  ;;  %3656 = vmatpush3.bf16.msra.mxu1 %v3922_v15 }
 0x736   :  { %3635 = vmatprep.subr.bf16.mxu0 %v3923_v16  ;;  %3657 = vmatprep.subr.bf16.mxu1 %v3924_v17  ;;  %v3937_v17 = vld [vmem:[%s5214_s11 + $0x100] sm:$0xff]  }
 0x739   :  { %3636 = vmatpush3.bf16.msra.mxu0 %v3925_v19  ;;  %3658 = vmatpush3.bf16.msra.mxu1 %v3926_v39  ;;  %v3938_v19 = vld [vmem:[%s5214_s11 + $0x180] sm:$0xff]   ;;  %v3939_v39 = vld [vmem:[%s5214_s11 + $0x148] sm:$0xff]  }
 0x73a   :  { %3637 = vmatprep.subr.bf16.mxu0 %v3927_v0  ;;  %3659 = vmatprep.subr.bf16.mxu1 %v3928_v29  ;;  %v3940_v0 = vld [vmem:[%s5214_s11 + $0x1c8] sm:$0xff]  }
 0x73b   :  { %v3941_v29 = vld [vmem:[%s5214_s11 + $0x108] sm:$0xff]  }
 0x73d   :  { %3638 = vmatpush3.bf16.msra.mxu0 %v3929_v21  ;;  %3660 = vmatpush3.bf16.msra.mxu1 %v3930_v22  ;;  %v3942_v21 = vld [vmem:[%s5214_s11 + $0x188] sm:$0xff]   ;;  %v3943_v22 = vld [vmem:[%s5214_s11 + $0x150] sm:$0xff]  }
 0x73e   :  { %3639 = vmatprep.subr.bf16.mxu0 %v3931_v23  ;;  %3661 = vmatprep.subr.bf16.mxu1 %v3932_v24  ;;  %v3944_v23 = vld [vmem:[%s5214_s11 + $0x1d0] sm:$0xff]  }
 0x73f   :  { %v3945_v24 = vld [vmem:[%s5214_s11 + $0x110] sm:$0xff]  }
 0x741   :  { %3640 = vmatpush3.bf16.msra.mxu0 %v3933_v25  ;;  %3662 = vmatpush3.bf16.msra.mxu1 %v3934_v26  ;;  %v3946_v25 = vld [vmem:[%s5214_s11 + $0x190] sm:$0xff]   ;;  %v3947_v26 = vld [vmem:[%s5214_s11 + $0x158] sm:$0xff]  }
 0x742   :  { %3669 = vmatprep.subr.bf16.mxu0 %v3935_v27  ;;  %3691 = vmatprep.subr.bf16.mxu1 %v3936_v28  ;;  %v3948_v27 = vld [vmem:[%s5214_s11 + $0x1d8] sm:$0xff]  }
 0x743   :  { %v3949_v28 = vld [vmem:[%s5214_s11 + $0x118] sm:$0xff]  }
 0x797   :  { %v1523_v54 = vpop.f32.mrb[16].mxu0  ;;  %v1566_v55 = vpop.f32.mrb[8].mxu1 }
 0x798   :  { %v1524_v56 = vadd.f32 %v1523_v54, %v772_v49  ;;  %v1567_v57 = vadd.f32 %v1566_v55, %v780_v51  ;;  %v1525_v58 = vpop.f32.mrb[17].mxu0  ;;  %v1568_v59 = vpop.f32.mrb[9].mxu1  ;;  %v3955_v54 = vld [vmem:[%s5214_s11 + $0x168] sm:$0xff]  }
 0x799   :  { %v1526_v60 = vadd.f32 %v1525_v58, %v776_v52  ;;  %v1569_v61 = vadd.f32 %v1568_v59, %v784_v53  ;;  %v1527_v62 = vpop.f32.mrb[18].mxu0  ;;  %v1570_v63 = vpop.f32.mrb[10].mxu1  ;;  %v3956_v55 = vld [vmem:[%s5214_s11 + $0x1e8] sm:$0xff]   ;;  %v788_v58 = vrot.slane %v4870_v48, %v787_v33  ;;  %v796_v59 = vrot.slane %v4870_v48, %v795_v34  ;;  %v3961_v34 = vld [vmem:[%s5214_s11 + $0x130] sm:$0xff]  }
 0x79a   :  { %v1528_v35 = vadd.f32 %v1527_v62, %v772_v49  ;;  %v1571_v36 = vadd.f32 %v1570_v63, %v780_v51  ;;  %v1529_v1 = vpop.f32.mrb[19].mxu0  ;;  %v1572_v2 = vpop.f32.mrb[11].mxu1  ;;  %v1833_v50 = vmax.f32 %v1524_v56, 0.0  ;;  %v1835_v5 = vmax.f32 %v1567_v57, 0.0  ;;  %v3951_v49 = vld [vmem:[%s5214_s11 + $0x160] sm:$0xff]   ;;  %v3957_v56 = vld [vmem:[%s5214_s11 + $0x128] sm:$0xff]  }
 0x79b   :  { %v1530_v3 = vadd.f32 %v1529_v1, %v776_v52  ;;  %v1573_v4 = vadd.f32 %v1572_v2, %v784_v53  ;;  %v1834_v8 = vmax.f32 %v1526_v60, 0.0  ;;  %v1836_v9 = vmax.f32 %v1569_v61, 0.0  ;;  %v3952_v51 = vld [vmem:[%s5214_s11 + $0x1e0] sm:$0xff]   ;;  %v3958_v57 = vld [vmem:[%s5214_s11 + $0x1a8] sm:$0xff]   ;;  %v3959_v60 = vld [vmem:[%s5214_s11 + $0x170] sm:$0xff]  }
 0x79c   :  { %v1849_v6 = vmax.f32 %v1528_v35, 0.0  ;;  %v1851_v7 = vmax.f32 %v1571_v36, 0.0  ;;  %v3953_v52 = vld [vmem:[%s5214_s11 + $0x120] sm:$0xff]   ;;  %v3960_v61 = vld [vmem:[%s5214_s11 + $0x1f0] sm:$0xff]   ;;  %v792_v62 = vrot.slane %v4870_v48, %v791_v18  ;;  %v800_v33 = vrot.slane %v4870_v48, %v799_v38  ;;  %v3964_v38 = vld [vmem:[%s5214_s11 + $0x1f8] sm:$0xff]  }
 0x79d   :  { %v1850_v10 = vmax.f32 %v1530_v3, 0.0  ;;  %v1852_v11 = vmax.f32 %v1573_v4, 0.0  ;;  %v3954_v53 = vld [vmem:[%s5214_s11 + $0x1a0] sm:$0xff]   ;;  %v3962_v36 = vld [vmem:[%s5214_s11 + $0x1b0] sm:$0xff]  }
 0x79e   :  { %v1865_v12 = vpack.c.bf16 %v1849_v6, %v1833_v50  ;;  %v1867_v13 = vpack.c.bf16 %v1851_v7, %v1835_v5 }
 0x79f   :  { %v1866_v15 = vpack.c.bf16 %v1850_v10, %v1834_v8  ;;  %v1868_v16 = vpack.c.bf16 %v1852_v11, %v1836_v9 }
 0x7a1   :  { %2944 = vmatprep.mubr.bf16.mxu0 %v1866_v15  ;;  %2985 = vmatprep.mubr.bf16.mxu1 %v1868_v16 }
 0x7a2   :  { %2945 = vmatmul.mubr.bf16.vlgmr.msra.gmra.mrb[32].mxu0 %v1865_v12  ;;  %2986 = vmatmul.mubr.bf16.vlgmr.msra.gmra.mrb[24].mxu1 %v1867_v13  ;;  %v3965_v12 = vld [vmem:[%s5214_s11 + $0x138] sm:$0xff]  }
 0x7a3   :  { %3670 = vmatpush3.bf16.msra.mxu0 %v3937_v17  ;;  %3692 = vmatpush3.bf16.msra.mxu1 %v3938_v19  ;;  %v3966_v13 = vld [vmem:[%s5214_s11 + $0x1b8] sm:$0xff]  }
 0x7a4   :  { %3671 = vmatprep.subr.bf16.mxu0 %v3939_v39  ;;  %3693 = vmatprep.subr.bf16.mxu1 %v3940_v0  ;;  %v3967_v39 = vld [vmem:[%s5214_s11 + $0x240] sm:$0xff]  }
 0x7a5   :  { %v3968_v0 = vld [vmem:[%s5214_s11 + $0x2c0] sm:$0xff]  }
 0x7a7   :  { %3672 = vmatpush3.bf16.msra.mxu0 %v3941_v29  ;;  %3694 = vmatpush3.bf16.msra.mxu1 %v3942_v21 }
 0x7a8   :  { %3673 = vmatprep.subr.bf16.mxu0 %v3943_v22  ;;  %3695 = vmatprep.subr.bf16.mxu1 %v3944_v23 }
 0x7ab   :  { %3674 = vmatpush3.bf16.msra.mxu0 %v3945_v24  ;;  %3696 = vmatpush3.bf16.msra.mxu1 %v3946_v25 }
 0x7ac   :  { %3675 = vmatprep.subr.bf16.mxu0 %v3947_v26  ;;  %3697 = vmatprep.subr.bf16.mxu1 %v3948_v27 }
 0x7af   :  { %3676 = vmatpush3.bf16.msra.mxu0 %v3949_v28  ;;  %3698 = vmatpush3.bf16.msra.mxu1 %v3950_v31  ;;  %v3969_v28 = vld [vmem:[%s5214_s11 + $0x200] sm:$0xff]  }
 0x7b0   :  { %3677 = vmatprep.subr.bf16.mxu0 %v3951_v49  ;;  %3699 = vmatprep.subr.bf16.mxu1 %v3952_v51  ;;  %v3970_v31 = vld [vmem:[%s5214_s11 + $0x280] sm:$0xff]   ;;  %v3971_v49 = vld [vmem:[%s5214_s11 + $0x248] sm:$0xff]  }
 0x7b1   :  { %v3972_v51 = vld [vmem:[%s5214_s11 + $0x2c8] sm:$0xff]  }
 0x7b3   :  { %3678 = vmatpush3.bf16.msra.mxu0 %v3953_v52  ;;  %3700 = vmatpush3.bf16.msra.mxu1 %v3954_v53  ;;  %v3973_v52 = vld [vmem:[%s5214_s11 + $0x208] sm:$0xff]  }
 0x7b4   :  { %3679 = vmatprep.subr.bf16.mxu0 %v3955_v54  ;;  %3701 = vmatprep.subr.bf16.mxu1 %v3956_v55  ;;  %v3974_v53 = vld [vmem:[%s5214_s11 + $0x288] sm:$0xff]   ;;  %v3975_v54 = vld [vmem:[%s5214_s11 + $0x250] sm:$0xff]  }
 0x7b5   :  { %v3976_v55 = vld [vmem:[%s5214_s11 + $0x2d0] sm:$0xff]  }
 0x7b7   :  { %v1609_v63 = vpop.f32.mrb[20].mxu0  ;;  %v1652_v35 = vpop.f32.mrb[12].mxu1  ;;  %3680 = vmatpush3.bf16.msra.mxu0 %v3957_v56  ;;  %3702 = vmatpush3.bf16.msra.mxu1 %v3958_v57  ;;  %v3977_v56 = vld [vmem:[%s5214_s11 + $0x210] sm:$0xff]  }
 0x7b8   :  { %v1610_v1 = vadd.f32 %v1609_v63, %v788_v58  ;;  %v1653_v2 = vadd.f32 %v1652_v35, %v796_v59  ;;  %v1611_v3 = vpop.f32.mrb[21].mxu0  ;;  %v1654_v18 = vpop.f32.mrb[13].mxu1  ;;  %3681 = vmatprep.subr.bf16.mxu0 %v3959_v60  ;;  %3703 = vmatprep.subr.bf16.mxu1 %v3960_v61  ;;  %v3978_v57 = vld [vmem:[%s5214_s11 + $0x290] sm:$0xff]   ;;  %v3981_v60 = vld [vmem:[%s5214_s11 + $0x218] sm:$0xff]   ;;  %v3985_v63 = vld [vmem:[%s5214_s11 + $0x220] sm:$0xff]  }
 0x7b9   :  { %v1612_v48 = vadd.f32 %v1611_v3, %v792_v62  ;;  %v1655_v4 = vadd.f32 %v1654_v18, %v800_v33  ;;  %v1613_v50 = vpop.f32.mrb[22].mxu0  ;;  %v1656_v5 = vpop.f32.mrb[14].mxu1  ;;  %v3982_v61 = vld [vmem:[%s5214_s11 + $0x298] sm:$0xff]   ;;  %v3986_v35 = vld [vmem:[%s5214_s11 + $0x2a0] sm:$0xff]   ;;  %v804_v3 = vrot.slane %v4837_v30, %v4238_v41  ;;  %v812_v18 = vrot.slane %v4837_v30, %v4241_v42  ;;  %v3993_v41 = vld [vmem:[%s5214_s11 + $0x230] sm:$0xff]  }
 0x7ba   :  { %v1614_v6 = vadd.f32 %v1613_v50, %v788_v58  ;;  %v1657_v7 = vadd.f32 %v1656_v5, %v796_v59  ;;  %v1615_v8 = vpop.f32.mrb[23].mxu0  ;;  %v1658_v9 = vpop.f32.mrb[15].mxu1  ;;  %v1837_v15 = vmax.f32 %v1610_v1, 0.0  ;;  %v1839_v16 = vmax.f32 %v1653_v2, 0.0  ;;  %v3979_v58 = vld [vmem:[%s5214_s11 + $0x258] sm:$0xff]   ;;  %v3989_v1 = vld [vmem:[%s5214_s11 + $0x228] sm:$0xff]  }
 0x7bb   :  { %v1616_v10 = vadd.f32 %v1615_v8, %v792_v62  ;;  %v1659_v11 = vadd.f32 %v1658_v9, %v800_v33  ;;  %3682 = vmatpush3.bf16.msra.mxu0 %v3961_v34  ;;  %3704 = vmatpush3.bf16.msra.mxu1 %v3962_v36  ;;  %v1838_v29 = vmax.f32 %v1612_v48, 0.0  ;;  %v1840_v21 = vmax.f32 %v1655_v4, 0.0  ;;  %v3980_v59 = vld [vmem:[%s5214_s11 + $0x2d8] sm:$0xff]   ;;  %v3983_v62 = vld [vmem:[%s5214_s11 + $0x260] sm:$0xff]   ;;  %v3987_v34 = vld [vmem:[%s5214_s11 + $0x268] sm:$0xff]  }
 0x7bc   :  { %v1853_v17 = vmax.f32 %v1614_v6, 0.0  ;;  %v1855_v19 = vmax.f32 %v1657_v7, 0.0  ;;  %3683 = vmatprep.subr.bf16.mxu0 %v3963_v40  ;;  %3705 = vmatprep.subr.bf16.mxu1 %v3964_v38  ;;  %v3984_v33 = vld [vmem:[%s5214_s11 + $0x2e0] sm:$0xff]   ;;  %v3988_v36 = vld [vmem:[%s5214_s11 + $0x2e8] sm:$0xff]   ;;  %v3991_v40 = vld [vmem:[%s5214_s11 + $0x270] sm:$0xff]   ;;  %v808_v48 = vrot.slane %v4837_v30, %v4247_v44 }
 0x7bd   :  { %v1854_v22 = vmax.f32 %v1616_v10, 0.0  ;;  %v1856_v23 = vmax.f32 %v1659_v11, 0.0  ;;  %v3990_v2 = vld [vmem:[%s5214_s11 + $0x2a8] sm:$0xff]   ;;  %v3992_v38 = vld [vmem:[%s5214_s11 + $0x2f0] sm:$0xff]   ;;  %v3995_v44 = vld [vmem:[%s5214_s11 + $0x278] sm:$0xff]  }
 0x7be   :  { %v1869_v24 = vpack.c.bf16 %v1853_v17, %v1837_v15  ;;  %v1871_v25 = vpack.c.bf16 %v1855_v19, %v1839_v16  ;;  %v3994_v42 = vld [vmem:[%s5214_s11 + $0x2b0] sm:$0xff]   ;;  %v3996_v30 = vld [vmem:[%s5214_s11 + $0x2f8] sm:$0xff]  }
 0x7bf   :  { %v1870_v26 = vpack.c.bf16 %v1854_v22, %v1838_v29  ;;  %v1872_v27 = vpack.c.bf16 %v1856_v23, %v1840_v21  ;;  %3684 = vmatpush3.bf16.msra.mxu0 %v3965_v12  ;;  %3706 = vmatpush3.bf16.msra.mxu1 %v3966_v13  ;;  %v3998_v29 = vld [vmem:[%s5214_s11 + $0x2b8] sm:$0xff]  }
 0x7c0   :  { %3713 = vmatprep.subr.bf16.mxu0 %v3967_v39  ;;  %3735 = vmatprep.subr.bf16.mxu1 %v3968_v0  ;;  %v3997_v0 = vld [vmem:[%s5214_s11 + $0x238] sm:$0xff]  }
 0x7c1   :  { %3026 = vmatprep.mubr.bf16.mxu0 %v1870_v26  ;;  %3067 = vmatprep.mubr.bf16.mxu1 %v1872_v27 }
 0x7c2   :  { %3027 = vmatmul.mubr.bf16.vlgmr.msra.gmra.mrb[36].mxu0 %v1869_v24  ;;  %3068 = vmatmul.mubr.bf16.vlgmr.msra.gmra.mrb[28].mxu1 %v1871_v25  ;;  %v4000_v25 = vld [vmem:[%s5214_s11 + $0x3c0] sm:$0xff]  }
 0x7c3   :  { %3714 = vmatpush3.bf16.msra.mxu0 %v3969_v28  ;;  %3736 = vmatpush3.bf16.msra.mxu1 %v3970_v31 }
 0x7c4   :  { %3715 = vmatprep.subr.bf16.mxu0 %v3971_v49  ;;  %3737 = vmatprep.subr.bf16.mxu1 %v3972_v51 }
 0x7c7   :  { %3716 = vmatpush3.bf16.msra.mxu0 %v3973_v52  ;;  %3738 = vmatpush3.bf16.msra.mxu1 %v3974_v53 }
 0x7c8   :  { %3717 = vmatprep.subr.bf16.mxu0 %v3975_v54  ;;  %3739 = vmatprep.subr.bf16.mxu1 %v3976_v55  ;;  %v4001_v54 = vld [vmem:[%s5214_s11 + $0x300] sm:$0xff]  }
 0x7c9   :  { %v4002_v55 = vld [vmem:[%s5214_s11 + $0x380] sm:$0xff]  }
 0x7cb   :  { %3718 = vmatpush3.bf16.msra.mxu0 %v3977_v56  ;;  %3740 = vmatpush3.bf16.msra.mxu1 %v3978_v57  ;;  %v4003_v56 = vld [vmem:[%s5214_s11 + $0x348] sm:$0xff]  }
 0x7cc   :  { %3719 = vmatprep.subr.bf16.mxu0 %v3979_v58  ;;  %3741 = vmatprep.subr.bf16.mxu1 %v3980_v59  ;;  %v4004_v57 = vld [vmem:[%s5214_s11 + $0x3c8] sm:$0xff]  }
 0x7cd   :  { %v4005_v58 = vld [vmem:[%s5214_s11 + $0x308] sm:$0xff]  }
 0x7ce   :  { %v4006_v59 = vld [vmem:[%s5214_s11 + $0x388] sm:$0xff]  }
 0x7cf   :  { %3720 = vmatpush3.bf16.msra.mxu0 %v3981_v60  ;;  %3742 = vmatpush3.bf16.msra.mxu1 %v3982_v61  ;;  %v4007_v60 = vld [vmem:[%s5214_s11 + $0x350] sm:$0xff]  }
 0x7d0   :  { %3721 = vmatprep.subr.bf16.mxu0 %v3983_v62  ;;  %3743 = vmatprep.subr.bf16.mxu1 %v3984_v33  ;;  %v4008_v61 = vld [vmem:[%s5214_s11 + $0x3d0] sm:$0xff]  }
 0x7d1   :  { %v4009_v62 = vld [vmem:[%s5214_s11 + $0x310] sm:$0xff]  }
 0x7d2   :  { %v4010_v33 = vld [vmem:[%s5214_s11 + $0x390] sm:$0xff]  }
 0x7d3   :  { %3722 = vmatpush3.bf16.msra.mxu0 %v3985_v63  ;;  %3744 = vmatpush3.bf16.msra.mxu1 %v3986_v35  ;;  %v4011_v63 = vld [vmem:[%s5214_s11 + $0x358] sm:$0xff]  }
 0x7d4   :  { %3723 = vmatprep.subr.bf16.mxu0 %v3987_v34  ;;  %3745 = vmatprep.subr.bf16.mxu1 %v3988_v36  ;;  %v4012_v35 = vld [vmem:[%s5214_s11 + $0x3d8] sm:$0xff]  }
 0x7d5   :  { %v4013_v34 = vld [vmem:[%s5214_s11 + $0x318] sm:$0xff]  }
 0x7d6   :  { %v4014_v36 = vld [vmem:[%s5214_s11 + $0x398] sm:$0xff]  }
 0x7d7   :  { %v1695_v4 = vpop.f32.mrb[24].mxu0  ;;  %v1738_v50 = vpop.f32.mrb[16].mxu1  ;;  %3724 = vmatpush3.bf16.msra.mxu0 %v3989_v1  ;;  %3746 = vmatpush3.bf16.msra.mxu1 %v3990_v2  ;;  %v4015_v1 = vld [vmem:[%s5214_s11 + $0x360] sm:$0xff]  }
 0x7d8   :  { %v1696_v5 = vadd.f32 %v1695_v4, %v804_v3  ;;  %v1739_v6 = vadd.f32 %v1738_v50, %v812_v18  ;;  %v1697_v7 = vpop.f32.mrb[25].mxu0  ;;  %v1740_v8 = vpop.f32.mrb[17].mxu1  ;;  %3725 = vmatprep.subr.bf16.mxu0 %v3991_v40  ;;  %3747 = vmatprep.subr.bf16.mxu1 %v3992_v38  ;;  %v4016_v2 = vld [vmem:[%s5214_s11 + $0x3e0] sm:$0xff]   ;;  %v4019_v40 = vld [vmem:[%s5214_s11 + $0x368] sm:$0xff]   ;;  %v4023_v50 = vld [vmem:[%s5214_s11 + $0x370] sm:$0xff]  }
 0x7d9   :  { %v1698_v9 = vadd.f32 %v1697_v7, %v808_v48  ;;  %v1741_v10 = vadd.f32 %v1740_v8, %v4841_v32  ;;  %v1699_v11 = vpop.f32.mrb[26].mxu0  ;;  %v1742_v12 = vpop.f32.mrb[18].mxu1  ;;  %v4020_v38 = vld [vmem:[%s5214_s11 + $0x3e8] sm:$0xff]   ;;  %v4026_v7 = vld [vmem:[%s5214_s11 + $0x3b0] sm:$0xff]  }
 0x7da   :  { %v1700_v13 = vadd.f32 %v1699_v11, %v804_v3  ;;  %v1743_v15 = vadd.f32 %v1742_v12, %v812_v18  ;;  %v1701_v16 = vpop.f32.mrb[27].mxu0  ;;  %v1744_v17 = vpop.f32.mrb[19].mxu1  ;;  %v1841_v21 = vmax.f32 %v1696_v5, 0.0  ;;  %v1843_v22 = vmax.f32 %v1739_v6, 0.0  ;;  %v4017_v3 = vld [vmem:[%s5214_s11 + $0x320] sm:$0xff]   ;;  %v4022_v4 = vld [vmem:[%s5214_s11 + $0x3a8] sm:$0xff]  }
 0x7db   :  { %v1702_v19 = vadd.f32 %v1701_v16, %v808_v48  ;;  %v1745_v39 = vadd.f32 %v1744_v17, %v4841_v32  ;;  %3726 = vmatpush3.bf16.msra.mxu0 %v3993_v41  ;;  %3748 = vmatpush3.bf16.msra.mxu1 %v3994_v42  ;;  %v3999_v32 = vld [vmem:[%s5214_s11 + $0x340] sm:$0xff]   ;;  %v1842_v26 = vmax.f32 %v1698_v9, 0.0  ;;  %v1844_v27 = vmax.f32 %v1741_v10, 0.0  ;;  %v4021_v48 = vld [vmem:[%s5214_s11 + $0x328] sm:$0xff]   ;;  %v4024_v41 = vld [vmem:[%s5214_s11 + $0x3f0] sm:$0xff]  }
 0x7dc   :  { %v1857_v23 = vmax.f32 %v1700_v13, 0.0  ;;  %v1859_v24 = vmax.f32 %v1743_v15, 0.0  ;;  %3727 = vmatprep.subr.bf16.mxu0 %v3995_v44  ;;  %3749 = vmatprep.subr.bf16.mxu1 %v3996_v30  ;;  %v4018_v18 = vld [vmem:[%s5214_s11 + $0x3a0] sm:$0xff]   ;;  %v4025_v6 = vld [vmem:[%s5214_s11 + $0x330] sm:$0xff]   ;;  %v4027_v10 = vld [vmem:[%s5214_s11 + $0x378] sm:$0xff]  }
 0x7dd   :  { %v1858_v28 = vmax.f32 %v1702_v19, 0.0  ;;  %v1860_v31 = vmax.f32 %v1745_v39, 0.0  ;;  %v4028_v11 = vld [vmem:[%s5214_s11 + $0x3f8] sm:$0xff]  }
 0x7de   :  { %v1873_v49 = vpack.c.bf16 %v1857_v23, %v1841_v21  ;;  %v1875_v51 = vpack.c.bf16 %v1859_v24, %v1843_v22  ;;  %v4029_v22 = vld [vmem:[%s5214_s11 + $0x338] sm:$0xff]  }
 0x7df   :  { %v1874_v52 = vpack.c.bf16 %v1858_v28, %v1842_v26  ;;  %v1876_v53 = vpack.c.bf16 %v1860_v31, %v1844_v27  ;;  %3728 = vmatpush3.bf16.msra.mxu0 %v3997_v0  ;;  %3750 = vmatpush3.bf16.msra.mxu1 %v3998_v29  ;;  %v4030_v23 = vld [vmem:[%s5214_s11 + $0x3b8] sm:$0xff]  }
 0x7e0   :  { %3757 = vmatprep.subr.bf16.mxu0 %v3999_v32  ;;  %3779 = vmatprep.subr.bf16.mxu1 %v4000_v25 }
 0x7e1   :  { %3108 = vmatprep.mubr.bf16.mxu0 %v1874_v52  ;;  %3149 = vmatprep.mubr.bf16.mxu1 %v1876_v53  ;;  %v3461_v53 = vld [vmem:[%s5217_s12] ss:$0 sm:$0xff] }
 0x7e2   :  { %3109 = vmatmul.mubr.bf16.vlgmr.msra.gmra.mrb[40].mxu0 %v1873_v49  ;;  %3150 = vmatmul.mubr.bf16.vlgmr.msra.gmra.mrb[32].mxu1 %v1875_v51 }
 0x7e3   :  { %3758 = vmatpush3.bf16.msra.mxu0 %v4001_v54  ;;  %3780 = vmatpush3.bf16.msra.mxu1 %v4002_v55 }
 0x7e4   :  { %3759 = vmatprep.subr.bf16.mxu0 %v4003_v56  ;;  %3781 = vmatprep.subr.bf16.mxu1 %v4004_v57 }
 0x7e7   :  { %3760 = vmatpush3.bf16.msra.mxu0 %v4005_v58  ;;  %3782 = vmatpush3.bf16.msra.mxu1 %v4006_v59 }
 0x7e8   :  { %3761 = vmatprep.subr.bf16.mxu0 %v4007_v60  ;;  %3783 = vmatprep.subr.bf16.mxu1 %v4008_v61 }
 0x7eb   :  { %3762 = vmatpush3.bf16.msra.mxu0 %v4009_v62  ;;  %3784 = vmatpush3.bf16.msra.mxu1 %v4010_v33 }
 0x7ec   :  { %3763 = vmatprep.subr.bf16.mxu0 %v4011_v63  ;;  %3785 = vmatprep.subr.bf16.mxu1 %v4012_v35 }
 0x7ef   :  { %3764 = vmatpush3.bf16.msra.mxu0 %v4013_v34  ;;  %3786 = vmatpush3.bf16.msra.mxu1 %v4014_v36 }
 0x7f0   :  { %3765 = vmatprep.subr.bf16.mxu0 %v4015_v1  ;;  %3787 = vmatprep.subr.bf16.mxu1 %v4016_v2 }
 0x7f3   :  { %3766 = vmatpush3.bf16.msra.mxu0 %v4017_v3  ;;  %3788 = vmatpush3.bf16.msra.mxu1 %v4018_v18 }
 0x7f4   :  { %3767 = vmatprep.subr.bf16.mxu0 %v4019_v40  ;;  %3789 = vmatprep.subr.bf16.mxu1 %v4020_v38 }
 0x7f7   :  { %v1781_v42 = vpop.f32.mrb[28].mxu0  ;;  %v1824_v5 = vpop.f32.mrb[20].mxu1  ;;  %3768 = vmatpush3.bf16.msra.mxu0 %v4021_v48  ;;  %3790 = vmatpush3.bf16.msra.mxu1 %v4022_v4 }
 0x7f8   :  { %v1782_v8 = vadd.f32 %v1781_v42, %v4848_v37  ;;  %v1825_v44 = vadd.f32 %v1824_v5, %v4855_v43  ;;  %v1783_v30 = vpop.f32.mrb[29].mxu0  ;;  %v1826_v9 = vpop.f32.mrb[21].mxu1  ;;  %3769 = vmatprep.subr.bf16.mxu0 %v4023_v50  ;;  %3791 = vmatprep.subr.bf16.mxu1 %v4024_v41 }
 0x7f9   :  { %v1784_v12 = vadd.f32 %v1783_v30, %v4860_v46  ;;  %v1827_v13 = vadd.f32 %v1826_v9, %v4865_v47  ;;  %v1785_v15 = vpop.f32.mrb[30].mxu0  ;;  %v1828_v16 = vpop.f32.mrb[22].mxu1 }
 0x7fa   :  { %v1786_v17 = vadd.f32 %v1785_v15, %v4848_v37  ;;  %v1829_v19 = vadd.f32 %v1828_v16, %v4855_v43  ;;  %v1787_v39 = vpop.f32.mrb[31].mxu0  ;;  %v1830_v0 = vpop.f32.mrb[23].mxu1  ;;  %v1845_v24 = vmax.f32 %v1782_v8, 0.0  ;;  %v1847_v37 = vmax.f32 %v1825_v44, 0.0 }
 0x7fb   :  { %v1788_v29 = vadd.f32 %v1787_v39, %v4860_v46  ;;  %v1831_v21 = vadd.f32 %v1830_v0, %v4865_v47  ;;  %3770 = vmatpush3.bf16.msra.mxu0 %v4025_v6  ;;  %3792 = vmatpush3.bf16.msra.mxu1 %v4026_v7  ;;  %v1846_v25 = vmax.f32 %v1784_v12, 0.0  ;;  %v1848_v46 = vmax.f32 %v1827_v13, 0.0 }
 0x7fc   :  { %v1861_v32 = vmax.f32 %v1786_v17, 0.0  ;;  %v1863_v43 = vmax.f32 %v1829_v19, 0.0  ;;  %3771 = vmatprep.subr.bf16.mxu0 %v4027_v10  ;;  %3793 = vmatprep.subr.bf16.mxu1 %v4028_v11 }
 0x7fd   :  { %v1862_v26 = vmax.f32 %v1788_v29, 0.0  ;;  %v1864_v47 = vmax.f32 %v1831_v21, 0.0 }
 0x7fe   :  { %v1877_v27 = vpack.c.bf16 %v1861_v32, %v1845_v24  ;;  %v1879_v28 = vpack.c.bf16 %v1863_v43, %v1847_v37 }
 0x7ff   :  { %v1878_v31 = vpack.c.bf16 %v1862_v26, %v1846_v25  ;;  %v1880_v49 = vpack.c.bf16 %v1864_v47, %v1848_v46  ;;  %3772 = vmatpush3.bf16.msra.mxu0 %v4029_v22  ;;  %3794 = vmatpush3.bf16.msra.mxu1 %v4030_v23 }
 0x801   :  { %3190 = vmatprep.mubr.bf16.mxu0 %v1878_v31  ;;  %3231 = vmatprep.mubr.bf16.mxu1 %v1880_v49 }
 0x802   :  { %3191 = vmatmul.mubr.bf16.vlgmr.msra.gmra.mrb[44].mxu0 %v1877_v27  ;;  %3232 = vmatmul.mubr.bf16.vlgmr.msra.gmra.mrb[36].mxu1 %v1879_v28 }
 0x875   :  { %v3641_v51 = vpop.f32.mrb[32].mxu0  ;;  %v3663_v52 = vpop.f32.mrb[24].mxu1 }
 0x876   :  { %v3642_v54 = vpop.f32.mrb[33].mxu0  ;;  %v3664_v55 = vpop.f32.mrb[25].mxu1 }
 0x877   :  { %v3643_v56 = vadd.f32 %v3642_v54, %v3641_v51  ;;  %v3665_v57 = vadd.f32 %v3664_v55, %v3663_v52  ;;  %v3644_v58 = vpop.f32.mrb[34].mxu0  ;;  %v3666_v59 = vpop.f32.mrb[26].mxu1 }
 0x878   :  { %v3645_v60 = vpop.f32.mrb[35].mxu0  ;;  %v3667_v61 = vpop.f32.mrb[27].mxu1 }
 0x879   :  { %v2947_v62 = vadd.f32 %v3643_v56, %v3461_v53  ;;  %v3646_v33 = vadd.f32 %v3645_v60, %v3644_v58  ;;  %v3668_v63 = vadd.f32 %v3667_v61, %v3666_v59 }
 0x87b   :  { %v2988_v35 = vadd.f32 %v3665_v57, %v2947_v62  ;;  %v2950_v34 = vadd.f32 %v3646_v33, %v3461_v53 }
 0x87d   :  { %v2991_v36 = vadd.f32 %v3668_v63, %v2950_v34 }
 0x895   :  { %v3685_v1 = vpop.f32.mrb[36].mxu0  ;;  %v3707_v2 = vpop.f32.mrb[28].mxu1 }
 0x896   :  { %v3686_v3 = vpop.f32.mrb[37].mxu0  ;;  %v3708_v18 = vpop.f32.mrb[29].mxu1 }
 0x897   :  { %v3687_v40 = vadd.f32 %v3686_v3, %v3685_v1  ;;  %v3709_v38 = vadd.f32 %v3708_v18, %v3707_v2  ;;  %v3688_v48 = vpop.f32.mrb[38].mxu0  ;;  %v3710_v4 = vpop.f32.mrb[30].mxu1 }
 0x898   :  { %v3689_v50 = vpop.f32.mrb[39].mxu0  ;;  %v3711_v41 = vpop.f32.mrb[31].mxu1 }
 0x899   :  { %v3029_v42 = vadd.f32 %v3687_v40, %v2988_v35  ;;  %v3690_v5 = vadd.f32 %v3689_v50, %v3688_v48  ;;  %v3712_v6 = vadd.f32 %v3711_v41, %v3710_v4  ;;  %v3590_v40 = vld [vmem:[%s5215_s8 + $0x2] ss:$0 sm:$0xff]  ;;  %v3591_v50 = vld [vmem:[%s5215_s8 + $0x3] ss:$0 sm:$0xff] }
 0x89b   :  { %v3070_v7 = vadd.f32 %v3709_v38, %v3029_v42  ;;  %v3032_v8 = vadd.f32 %v3690_v5, %v2991_v36 }
 0x89d   :  { %v3073_v44 = vadd.f32 %v3712_v6, %v3032_v8 }
 0x8b5   :  { %v3729_v30 = vpop.f32.mrb[40].mxu0  ;;  %v3751_v9 = vpop.f32.mrb[32].mxu1 }
 0x8b6   :  { %v3730_v10 = vpop.f32.mrb[41].mxu0  ;;  %v3752_v11 = vpop.f32.mrb[33].mxu1 }
 0x8b7   :  { %v3731_v12 = vadd.f32 %v3730_v10, %v3729_v30  ;;  %v3753_v13 = vadd.f32 %v3752_v11, %v3751_v9  ;;  %v3732_v15 = vpop.f32.mrb[42].mxu0  ;;  %v3754_v16 = vpop.f32.mrb[34].mxu1 }
 0x8b8   :  { %v3733_v17 = vpop.f32.mrb[43].mxu0  ;;  %v3755_v19 = vpop.f32.mrb[35].mxu1 }
 0x8b9   :  { %v3111_v39 = vadd.f32 %v3731_v12, %v3070_v7  ;;  %v3734_v0 = vadd.f32 %v3733_v17, %v3732_v15  ;;  %v3756_v29 = vadd.f32 %v3755_v19, %v3754_v16 }
 0x8bb   :  { %v3152_v21 = vadd.f32 %v3753_v13, %v3111_v39  ;;  %v3114_v22 = vadd.f32 %v3734_v0, %v3073_v44 }
 0x8bd   :  { %v3155_v23 = vadd.f32 %v3756_v29, %v3114_v22 }
 0x8d5   :  { %v3773_v24 = vpop.f32.mrb[44].mxu0  ;;  %v3795_v37 = vpop.f32.mrb[36].mxu1 }
 0x8d6   :  { %v3774_v32 = vpop.f32.mrb[45].mxu0  ;;  %v3796_v43 = vpop.f32.mrb[37].mxu1 }
 0x8d7   :  { %v3775_v25 = vadd.f32 %v3774_v32, %v3773_v24  ;;  %v3797_v46 = vadd.f32 %v3796_v43, %v3795_v37  ;;  %v3776_v26 = vpop.f32.mrb[46].mxu0  ;;  %v3798_v47 = vpop.f32.mrb[38].mxu1 }
 0x8d8   :  { %v3777_v27 = vpop.f32.mrb[47].mxu0  ;;  %v3799_v28 = vpop.f32.mrb[39].mxu1 }
 0x8d9   :  { %v3193_v31 = vadd.f32 %v3775_v25, %v3152_v21  ;;  %v3778_v49 = vadd.f32 %v3777_v27, %v3776_v26  ;;  %v3800_v51 = vadd.f32 %v3799_v28, %v3798_v47 }
 0x8db   :  { %v3234_v52 = vadd.f32 %v3797_v46, %v3193_v31  ;;  %v3196_v53 = vadd.f32 %v3778_v49, %v3155_v23 }
 0x8dd   :  { %v3237_v54 = vadd.f32 %v3800_v51, %v3196_v53  ;;  %v3240_v55 = vadd.f32 %v3234_v52, %v4446_v45 }
 0x8df   :  { %3244 = vadd.xlane.f32.xlu0 %v3240_v55  ;;  %v3241_v56 = vadd.f32 %v3237_v54, %v4448_v20 }
 0x8e1   :  { %3246 = vadd.xlane.f32.xlu1 %v3241_v56 }
 0x96c   :  { %v3245_v57 = vpop.xlane.xlu0 %3244 }
 0x96d   :  { %v3248_v58 = vmul.f32 0.03125, %v3245_v57 }
 0x96e   :  { %v3247_v59 = vpop.xlane.xlu1 %3246 }
 0x96f   :  { %v3250_v60 = vsub.f32 %v3240_v55, %v3248_v58  ;;  %v3249_v61 = vmul.f32 0.03125, %v3247_v59 }
 0x971   :  { %v3251_v62 = vsub.f32 %v3241_v56, %v3249_v61  ;;  %v3252_v33 = vmul.f32 %v4330_v14, %v3250_v60 }
 0x973   :  { %v3254_v63 = vmul.f32 %v3252_v33, %v3252_v33  ;;  %v3253_v35 = vmul.f32 %v4330_v14, %v3251_v62 }
 0x975   :  { %3256 = vadd.xlane.f32.xlu0 %v3254_v63  ;;  %v3255_v34 = vmul.f32 %v3253_v35, %v3253_v35 }
 0x977   :  { %3258 = vadd.xlane.f32.xlu1 %v3255_v34 }
 0xa02   :  { %v3257_v36 = vpop.xlane.xlu0 %3256 }
 0xa03   :  { %v3260_v45 = vmul.f32 0.03125, %v3257_v36 }
 0xa04   :  { %v3259_v1 = vpop.xlane.xlu1 %3258 }
 0xa05   :  { %v3262_v2 = vadd.f32 1e-05, %v3260_v45  ;;  %v3261_v20 = vmul.f32 0.03125, %v3259_v1 }
 0xa07   :  { %4043 = vrsqrt.f32 %v3262_v2  ;;  %v3263_v3 = vadd.f32 1e-05, %v3261_v20 }
 0xa09   :  { %4045 = vrsqrt.f32 %v3263_v3 }
 0xa11   :  { %v4044_v18 = vpop.eup %4043 }
 0xa12   :  { %v3266_v38 = vmul.f32 %v4044_v18, %v3252_v33 }
 0xa13   :  { %v4046_v48 = vpop.eup %4045 }
 0xa14   :  { %v3272_v4 = vmul.f32 %v3590_v40, %v3266_v38  ;;  %v3267_v14 = vmul.f32 %v4046_v48, %v3253_v35 }
 0xa16   :  { %v3273_v41 = vmul.f32 %v3590_v40, %v3267_v14  ;;  %v3278_v42 = vadd.f32 %v3591_v50, %v3272_v4 }
 0xa18   :  { %v3279_v5 = vadd.f32 %v3591_v50, %v3273_v41 }
 0xa1a   :  { %v3599_v6 = vpack.c.bf16 %v3279_v5, %v3278_v42 }
 0xa1c   :  { %3600 = vst [vmem:[%s5218_s13] sm:$0xff] %v3599_v6  }

</bundles_post_ra>
